<compile_context>
chip_gen: v7x
topology: tpu7x:2x2x1
jax: 0.10.0
libtpu: 0.0.40
codegen_flags: <defaults>
</compile_context>

<pallas_src>
import math

import jax
import jax.numpy as jnp
from jax import lax
from jax.experimental import pallas as pl
from jax.experimental.pallas import tpu as pltpu


def hawkes_gru_kernel(x_ref, w_i_ref, w_h_ref, b_i_ref, b_hn_ref,
                      w_q_ref, w_oa_ref, w_ob_ref, ae_ref, ab_ref,
                      emb_ref, gi_ref, ctx_ref):
    """Fused GRU recurrence + attention + Hawkes decay + output projection.

    All MXU matmuls use bf16 operands with f32 accumulation; carried state,
    softmax and Hawkes math stay f32.  Per-timestep tensors live in VMEM
    scratch (gi_ref, ctx_ref); only O(bt*Hp) values stay in vregs.
    """
    S, B, I = x_ref.shape          # B = batch tile, I = input size
    Hp = emb_ref.shape[-1]         # lane-padded hidden size (multiple of 128)

    # ---- 1) hoisted input projection: one (S*B, I) @ (I, 3Hp) MXU matmul.
    #     Gate order along 3Hp is [r | z | n]; b_i already holds the folded
    #     r/z hidden biases.  Result is parked in VMEM so it does not compete
    #     with the recurrence for vregs.
    x_flat = x_ref[...].reshape(S * B, I)                           # bf16
    gi_ref[...] = (
        jnp.dot(x_flat, w_i_ref[...], preferred_element_type=jnp.float32)
        + b_i_ref[...]
    ).reshape(S, B, 3 * Hp)

    # n-gate hidden bias: broadcast ONCE (JAX does not CSE broadcast_in_dim;
    # doing this inside the unrolled loop would emit S broadcasts).
    b_hn = jnp.broadcast_to(b_hn_ref[...], (B, Hp))                 # (B, Hp) f32

    # ---- 2) GRU recurrence: one fused (B,Hp)@(Hp,3Hp) dot per step.  Each
    #     step's hidden state goes straight to the VMEM ctx scratch as a
    #     lane-dense store.
    # TODO(synk): for S beyond ~32 swap the Python unroll for
    # lax.fori_loop(..., unroll=4) over the same scratch layout to bound code
    # size / vreg live ranges / compile time.
    h = jnp.zeros((B, Hp), jnp.float32)
    for t in range(S):
        gi = gi_ref[t]                                              # (B, 3Hp) f32
        gh = jnp.dot(h.astype(jnp.bfloat16), w_h_ref[...],
                     preferred_element_type=jnp.float32)            # (B, 3Hp) f32
        r = jax.nn.sigmoid(gi[:, :Hp] + gh[:, :Hp])
        z = jax.nn.sigmoid(gi[:, Hp:2 * Hp] + gh[:, Hp:2 * Hp])
        n = jnp.tanh(gi[:, 2 * Hp:] + r * (gh[:, 2 * Hp:] + b_hn))
        h = (1.0 - z) * n + z * h
        ctx_ref[t] = h                                              # lane-dense vst

    # ---- 3) attention.  query = h_last @ W_in^T (weight pre-transposed).
    #     scores is a per-batch matvec (N=1): as a dot_general it would run at
    #     ~1/256 MXU fill on v6e/v7x plus a relayout, so the VPU multiply +
    #     XLU lane reduction is the right unit at any H.
    query = jnp.dot(h.astype(jnp.bfloat16), w_q_ref[...],
                    preferred_element_type=jnp.float32)             # (B, Hp) f32

    scores = [jnp.sum(ctx_ref[t] * query, axis=-1, keepdims=True)   # (B, 1)
              for t in range(S)]
    m = scores[0]
    for t in range(1, S):
        m = jnp.maximum(m, scores[t])
    p = [jnp.exp(s - m) for s in scores]
    denom = p[0]
    for t in range(1, S):
        denom = denom + p[t]
    inv = pl.reciprocal(denom, approx=True)                         # EUP slot

    # ---- 4) Hawkes decay + mix accumulation, one ctx step at a time.
    #     coef[t, b] = ae[b] * exp(-ab[b] * (S-1-t)); relu stays on coef*mix
    #     because ae is learned and may be negative.
    ae = ae_ref[...]                                                # (B, 1) f32
    ab = ab_ref[...]                                                # (B, 1) f32
    mix_sum = jnp.zeros((B, Hp), jnp.float32)
    for t in range(S):
        c = ctx_ref[t]                                              # (B, Hp) f32
        mix_t = (p[t] * inv) * c
        coef_t = ae * jnp.exp(ab * (-float(S - 1 - t)))             # (B, 1)
        mix_sum = mix_sum + mix_t + jnp.maximum(coef_t * mix_t, 0.0)

    # ---- 5) output projection (concat-free: split weight, two accumulated
    #     dots) + tanh; the (B, Hp) store is lane-dense / unmasked.
    out = (jnp.dot(mix_sum.astype(jnp.bfloat16), w_oa_ref[...],
                   preferred_element_type=jnp.float32)
           + jnp.dot(query.astype(jnp.bfloat16), w_ob_ref[...],
                     preferred_element_type=jnp.float32))
    emb_ref[...] = jnp.tanh(out)


def _round_up(n, m):
    return ((n + m - 1) // m) * m


def _const_spec(shape):
    """Whole-array block, same block at every grid step (weights).

    TODO(synk): at production sizes on v7x (64 MiB VMEM) mark these
    pipeline_mode=pl.Buffered(1) to drop the second VMEM copy of each weight.
    """
    return pl.BlockSpec(shape, lambda b, _n=len(shape): (0,) * _n)


def _choose_batch_tiling(batch, *, num_tensorcores=1):
    """Sublane-aligned batch tile.

    Cap at 256 to fill the 256-row MXU on v6e/v7x.  When the chip has multiple
    TensorCores (v7x: set num_tensorcores=2), prefer >= num_tensorcores grid
    steps (without dropping the tile below 128 rows) so the "parallel" batch
    axis shards across all cores.
    """
    b_al = _round_up(batch, 8)
    bt = min(b_al, 256)
    if num_tensorcores > 1 and b_al >= 128 * num_tensorcores:
        bt = max(128, min(bt, _round_up(-(-b_al // num_tensorcores), 8)))
    b_pad = _round_up(b_al, bt)
    return bt, b_pad, b_pad // bt


def _vmem_limit_bytes(S, bt, I, Hp):
    """Shape-derived scoped-VMEM limit with 2x headroom, capped at ~48 MiB so
    double-buffering survives on v7x's 64 MiB VMEM."""
    bf16, f32 = 2, 4
    weights = ((I * 3 * Hp + Hp * 3 * Hp + 3 * Hp * Hp) * bf16
               + (3 * Hp + Hp) * f32)
    est = (2 * S * bt * I * bf16            # x block, double-buffered
           + 2 * bt * Hp * f32              # output block, double-buffered
           + 2 * weights                    # weights (default double-buffered)
           + S * bt * 3 * Hp * f32          # gi scratch
           + S * bt * Hp * f32              # ctx scratch
           + 4 * bt * f32)                  # ae / ab blocks
    return int(min(max(2 * est, 16 << 20), 48 << 20))


def hawkes_gru_forward(x_bsi, pt, ae_b, ab_b, *, num_tensorcores=1):
    """HawkesGRU forward.

    x_bsi : (batch, seq, input) f32 — input_data['x'].squeeze()
    pt    : PyTorch-layout params: w_ih (3H,I), w_hh (3H,H), b_ih (3H,),
            b_hh (3H,), w_lin_in (H,H), w_lin_out (H,2H)
    ae_b, ab_b : (batch,) Hawkes params already gathered by ticker index.
    Returns emb (batch, H) f32.
    """
    B, S, I = x_bsi.shape
    H = pt["w_lin_in"].shape[0]
    Hp = _round_up(H, 128)          # lane-pad hidden: gate slices vreg-aligned,
                                    # output store unmasked lane-dense.

    # ---- wrapper-side weight packing: transpose, per-gate zero-pad to Hp,
    #      fold r/z hidden biases into the input bias, cast MXU operands bf16.
    def pad_gates(w):               # (K, 3H) -> (K, 3Hp)
        return jnp.concatenate(
            [jnp.pad(w[:, g * H:(g + 1) * H], ((0, 0), (0, Hp - H)))
             for g in range(3)], axis=-1)

    def pad_sq(w):                  # (H, H) -> (Hp, Hp)
        return jnp.pad(w, ((0, Hp - H), (0, Hp - H)))

    w_i = pad_gates(pt["w_ih"].T).astype(jnp.bfloat16)                  # (I, 3Hp)
    w_h = jnp.pad(pad_gates(pt["w_hh"].T),
                  ((0, Hp - H), (0, 0))).astype(jnp.bfloat16)           # (Hp, 3Hp)
    b_ih, b_hh = pt["b_ih"], pt["b_hh"]
    b_fused = jnp.concatenate(                                          # (1, 3Hp)
        [jnp.pad(b_ih[:H] + b_hh[:H], (0, Hp - H)),                     # r folded
         jnp.pad(b_ih[H:2 * H] + b_hh[H:2 * H], (0, Hp - H)),           # z folded
         jnp.pad(b_ih[2 * H:], (0, Hp - H))]                            # n (input)
    ).reshape(1, 3 * Hp).astype(jnp.float32)
    b_hn = jnp.pad(b_hh[2 * H:], (0, Hp - H)).reshape(1, Hp).astype(jnp.float32)
    w_q = pad_sq(pt["w_lin_in"].T).astype(jnp.bfloat16)                 # (Hp, Hp)
    w_oa = pad_sq(pt["w_lin_out"][:, :H].T).astype(jnp.bfloat16)        # mix_sum half
    w_ob = pad_sq(pt["w_lin_out"][:, H:].T).astype(jnp.bfloat16)        # query half

    bt, b_pad, nb = _choose_batch_tiling(B, num_tensorcores=num_tensorcores)

    # Time-major, bf16 x (halves HBM/VMEM bytes of the only streamed input).
    x_sbi = jnp.transpose(x_bsi, (1, 0, 2)).astype(jnp.bfloat16)
    if b_pad != B:
        x_sbi = jnp.pad(x_sbi, ((0, 0), (0, b_pad - B), (0, 0)))
    ae_col = jnp.zeros((b_pad, 1), jnp.float32).at[:B, 0].set(ae_b.astype(jnp.float32))
    ab_col = jnp.zeros((b_pad, 1), jnp.float32).at[:B, 0].set(ab_b.astype(jnp.float32))

    out = pl.pallas_call(
        hawkes_gru_kernel,
        out_shape=jax.ShapeDtypeStruct((b_pad, Hp), jnp.float32),
        grid=(nb,),
        in_specs=[
            # x, tiled on batch.  TODO(synk): if profiling shows the next
            # tile's HBM fetch exposed at small H, use pipeline_mode=pl.Buffered(3).
            pl.BlockSpec((S, bt, I), lambda b: (0, b, 0)),
            _const_spec(w_i.shape),                 # (I, 3Hp)
            _const_spec(w_h.shape),                 # (Hp, 3Hp)
            _const_spec(b_fused.shape),             # (1, 3Hp)
            _const_spec(b_hn.shape),                # (1, Hp)
            _const_spec(w_q.shape),                 # (Hp, Hp)
            _const_spec(w_oa.shape),                # (Hp, Hp)
            _const_spec(w_ob.shape),                # (Hp, Hp)
            pl.BlockSpec((bt, 1), lambda b: (b, 0)),  # ae per batch row
            pl.BlockSpec((bt, 1), lambda b: (b, 0)),  # ab per batch row
        ],
        out_specs=pl.BlockSpec((bt, Hp), lambda b: (b, 0)),
        scratch_shapes=[
            pltpu.VMEM((S, bt, 3 * Hp), jnp.float32),   # hoisted input gates
            pltpu.VMEM((S, bt, Hp), jnp.float32),       # per-step hidden states
        ],
        compiler_params=pltpu.CompilerParams(
            dimension_semantics=("parallel",),
            vmem_limit_bytes=_vmem_limit_bytes(S, bt, I, Hp)),
    )(x_sbi, w_i, w_h, b_fused, b_hn, w_q, w_oa, w_ob, ae_col, ab_col)

    return out[:B, :H]


def reference_forward(x_bsi, pt, ae_b, ab_b):
    """Pure-JAX f32 re-implementation of the PyTorch forward (validation)."""
    w_ih, w_hh, b_ih, b_hh = pt["w_ih"], pt["w_hh"], pt["b_ih"], pt["b_hh"]
    H = w_hh.shape[1]
    B, S, _ = x_bsi.shape

    def cell(h, x_t):
        gi = x_t @ w_ih.T + b_ih
        gh = h @ w_hh.T + b_hh
        i_r, i_z, i_n = jnp.split(gi, 3, axis=-1)
        h_r, h_z, h_n = jnp.split(gh, 3, axis=-1)
        r = jax.nn.sigmoid(i_r + h_r)
        z = jax.nn.sigmoid(i_z + h_z)
        n = jnp.tanh(i_n + r * h_n)
        h_new = (1.0 - z) * n + z * h
        return h_new, h_new

    h0 = jnp.zeros((B, H), jnp.float32)
    h_last, ctx_sbh = lax.scan(cell, h0, jnp.transpose(x_bsi, (1, 0, 2)))
    ctx = jnp.transpose(ctx_sbh, (1, 0, 2))                  # (B, S, H)

    query = h_last @ pt["w_lin_in"].T                        # (B, H)
    scores = jnp.einsum("bh,bsh->bs", query, ctx)
    att = jax.nn.softmax(scores, axis=-1)
    mix = att[:, :, None] * ctx
    delta = jnp.arange(S - 1, -1, -1, dtype=jnp.float32)
    bt = jnp.exp(-ab_b[:, None] * delta[None, :])
    term2 = jax.nn.relu(ae_b[:, None, None] * mix * bt[:, :, None])
    mix_sum = jnp.sum(term2 + mix, axis=1)
    combined = jnp.concatenate([mix_sum, query], axis=-1)
    return jnp.tanh(combined @ pt["w_lin_out"].T)


if __name__ == "__main__":
    B, S, I, H = 4, 8, 16, 32
    num_tickers = 6

    key = jax.random.PRNGKey(0)
    ks = jax.random.split(key, 10)
    kg = 1.0 / math.sqrt(H)
    k2 = 1.0 / math.sqrt(2 * H)

    # PyTorch-layout parameters (deterministic synthetic init).
    pt = dict(
        w_ih=jax.random.uniform(ks[0], (3 * H, I), jnp.float32, -kg, kg),
        w_hh=jax.random.uniform(ks[1], (3 * H, H), jnp.float32, -kg, kg),
        b_ih=jax.random.uniform(ks[2], (3 * H,), jnp.float32, -kg, kg),
        b_hh=jax.random.uniform(ks[3], (3 * H,), jnp.float32, -kg, kg),
        w_lin_in=jax.random.uniform(ks[4], (H, H), jnp.float32, -kg, kg),
        w_lin_out=jax.random.uniform(ks[5], (H, 2 * H), jnp.float32, -k2, k2),
    )
    ae_full = jax.random.uniform(ks[6], (num_tickers, 1, 1), jnp.float32, 0.0, 0.5)
    ab_full = jax.random.uniform(ks[7], (num_tickers, 1, 1), jnp.float32, 0.0, 0.5)

    # Ticker gather (host-side glue, mirrors ae[ticker_indices] in the module).
    ticker_indices = jnp.arange(B) % num_tickers
    ae_b = ae_full[ticker_indices, 0, 0]                     # (B,)
    ab_b = ab_full[ticker_indices, 0, 0]                     # (B,)

    x = jax.random.normal(ks[8], (B, S, I), jnp.float32)     # input_data['x'].squeeze()

    emb = hawkes_gru_forward(x, pt, ae_b, ab_b)              # num_tensorcores=2 on v7x
    emb = jax.block_until_ready(emb)

    ref = reference_forward(x, pt, ae_b, ab_b)

    assert emb.shape == (B, H), emb.shape
    max_err = float(jnp.max(jnp.abs(emb - ref)))
    # Tolerance loosened vs the all-f32 version: bf16 MXU operands + approx
    # EUP reciprocal in the softmax (outputs are tanh-bounded, so abs error
    # of a few 1e-3..1e-2 is expected and benign).
    assert jnp.allclose(emb, ref, atol=3e-2, rtol=3e-2), f"max_err={max_err}"
    print("KERNEL_OK")
</pallas_src>

<mosaic_0001>
module attributes {stable_mosaic.version = 11 : i64} {
  func.func @hawkes_gru_kernel(%arg0: i32, %arg1: memref<8x8x16xbf16, #tpu.memory_space<vmem>>, %arg2: memref<16x384xbf16, #tpu.memory_space<vmem>>, %arg3: memref<128x384xbf16, #tpu.memory_space<vmem>>, %arg4: memref<1x384xf32, #tpu.memory_space<vmem>>, %arg5: memref<1x128xf32, #tpu.memory_space<vmem>>, %arg6: memref<128x128xbf16, #tpu.memory_space<vmem>>, %arg7: memref<128x128xbf16, #tpu.memory_space<vmem>>, %arg8: memref<128x128xbf16, #tpu.memory_space<vmem>>, %arg9: memref<8x1xf32, #tpu.memory_space<vmem>>, %arg10: memref<8x1xf32, #tpu.memory_space<vmem>>, %arg11: memref<8x128xf32, #tpu.memory_space<vmem>>, %arg12: memref<8x8x384xf32, #tpu.memory_space<vmem>>, %arg13: memref<8x8x128xf32, #tpu.memory_space<vmem>>) attributes {dimension_semantics = [#tpu.dimension_semantics<parallel>], iteration_bounds = array<i64: 1>, scalar_prefetch = 0 : i64, scratch_operands = 2 : i64, tpu.core_type = #tpu.core_type<tc>, window_params = [{transform_indices = @transform_0, window_bounds = array<i64: 8, 8, 16>}, {pipeline_mode = #tpu.pipeline_mode<synchronous>, transform_indices = @transform_1, window_bounds = array<i64: 16, 384>}, {pipeline_mode = #tpu.pipeline_mode<synchronous>, transform_indices = @transform_2, window_bounds = array<i64: 128, 384>}, {pipeline_mode = #tpu.pipeline_mode<synchronous>, transform_indices = @transform_3, window_bounds = array<i64: 1, 384>}, {pipeline_mode = #tpu.pipeline_mode<synchronous>, transform_indices = @transform_4, window_bounds = array<i64: 1, 128>}, {pipeline_mode = #tpu.pipeline_mode<synchronous>, transform_indices = @transform_5, window_bounds = array<i64: 128, 128>}, {pipeline_mode = #tpu.pipeline_mode<synchronous>, transform_indices = @transform_6, window_bounds = array<i64: 128, 128>}, {pipeline_mode = #tpu.pipeline_mode<synchronous>, transform_indices = @transform_7, window_bounds = array<i64: 128, 128>}, {transform_indices = @transform_8, window_bounds = array<i64: 8, 1>}, {transform_indices = @transform_9, window_bounds = array<i64: 8, 1>}, {transform_indices = @transform_10, window_bounds = array<i64: 8, 128>}]} {
    %c0 = arith.constant 0 : index
    %c0_0 = arith.constant 0 : index
    %c0_1 = arith.constant 0 : index
    %0 = vector.load %arg1[%c0, %c0_0, %c0_1] : memref<8x8x16xbf16, #tpu.memory_space<vmem>>, vector<8x8x16xbf16>
    %1 = vector.shape_cast %0 : vector<8x8x16xbf16> to vector<64x16xbf16>
    %c0_2 = arith.constant 0 : index
    %c0_3 = arith.constant 0 : index
    %2 = vector.load %arg2[%c0_2, %c0_3] : memref<16x384xbf16, #tpu.memory_space<vmem>>, vector<16x384xbf16>
    %cst = arith.constant dense<0.000000e+00> : vector<64x384xf32>
    %3 = tpu.matmul %1, %2, %cst {dimension_numbers = #tpu.dot_dimension_numbers<[1], [0], [0], [1], [0, 0, 1, 1], [], []>} : vector<64x16xbf16>, vector<16x384xbf16>, vector<64x384xf32> -> vector<64x384xf32>
    %c0_4 = arith.constant 0 : index
    %c0_5 = arith.constant 0 : index
    %4 = vector.load %arg4[%c0_4, %c0_5] : memref<1x384xf32, #tpu.memory_space<vmem>>, vector<1x384xf32>
    %5 = vector.broadcast %4 : vector<1x384xf32> to vector<64x384xf32>
    %6 = arith.addf %3, %5 : vector<64x384xf32>
    %7 = vector.shape_cast %6 : vector<64x384xf32> to vector<8x8x384xf32>
    %c0_6 = arith.constant 0 : index
    %c0_7 = arith.constant 0 : index
    %c0_8 = arith.constant 0 : index
    %8 = vector.load %arg12[%c0_6, %c0_7, %c0_8] : memref<8x8x384xf32, #tpu.memory_space<vmem>>, vector<8x8x384xf32>
    tpu.vector_store %arg12[%c0_6, %c0_7, %c0_8], %7 {strides = array<i32>} : memref<8x8x384xf32, #tpu.memory_space<vmem>>, vector<8x8x384xf32>,
    %c0_9 = arith.constant 0 : index
    %c0_10 = arith.constant 0 : index
    %9 = vector.load %arg5[%c0_9, %c0_10] : memref<1x128xf32, #tpu.memory_space<vmem>>, vector<1x128xf32>
    %10 = vector.shape_cast %9 : vector<1x128xf32> to vector<1x128xf32>
    %11 = vector.broadcast %10 : vector<1x128xf32> to vector<8x128xf32>
    %cst_11 = arith.constant 0.000000e+00 : f32
    %12 = vector.broadcast %cst_11 : f32 to vector<8x128xf32>
    %c0_12 = arith.constant 0 : index
    %c0_13 = arith.constant 0 : index
    %c0_14 = arith.constant 0 : index
    %13 = vector.load %arg12[%c0_12, %c0_13, %c0_14] : memref<8x8x384xf32, #tpu.memory_space<vmem>>, vector<1x8x384xf32>
    %14 = vector.shape_cast %13 : vector<1x8x384xf32> to vector<8x384xf32>
    %15 = arith.truncf %12 : vector<8x128xf32> to vector<8x128xbf16>
    %c0_15 = arith.constant 0 : index
    %c0_16 = arith.constant 0 : index
    %16 = vector.load %arg3[%c0_15, %c0_16] : memref<128x384xbf16, #tpu.memory_space<vmem>>, vector<128x384xbf16>
    %cst_17 = arith.constant dense<0.000000e+00> : vector<8x384xf32>
    %17 = tpu.matmul %15, %16, %cst_17 {dimension_numbers = #tpu.dot_dimension_numbers<[1], [0], [0], [1], [0, 0, 1, 1], [], []>} : vector<8x128xbf16>, vector<128x384xbf16>, vector<8x384xf32> -> vector<8x384xf32>
    %18 = vector.extract_strided_slice %14 {offsets = [0, 0], sizes = [8, 128], strides = [1, 1]} : vector<8x384xf32> to vector<8x128xf32>
    %19 = vector.extract_strided_slice %17 {offsets = [0, 0], sizes = [8, 128], strides = [1, 1]} : vector<8x384xf32> to vector<8x128xf32>
    %20 = arith.addf %18, %19 : vector<8x128xf32>
    %21 = arith.negf %20 : vector<8x128xf32>
    %22 = math.exp %21 : vector<8x128xf32>
    %cst_18 = arith.constant 1.000000e+00 : f32
    %23 = vector.broadcast %cst_18 : f32 to vector<8x128xf32>
    %24 = arith.addf %23, %22 : vector<8x128xf32>
    %25 = arith.divf %23, %24 : vector<8x128xf32>
    %26 = vector.extract_strided_slice %14 {offsets = [0, 128], sizes = [8, 128], strides = [1, 1]} : vector<8x384xf32> to vector<8x128xf32>
    %27 = vector.extract_strided_slice %17 {offsets = [0, 128], sizes = [8, 128], strides = [1, 1]} : vector<8x384xf32> to vector<8x128xf32>
    %28 = arith.addf %26, %27 : vector<8x128xf32>
    %29 = arith.negf %28 : vector<8x128xf32>
    %30 = math.exp %29 : vector<8x128xf32>
    %cst_19 = arith.constant 1.000000e+00 : f32
    %31 = vector.broadcast %cst_19 : f32 to vector<8x128xf32>
    %32 = arith.addf %31, %30 : vector<8x128xf32>
    %33 = arith.divf %31, %32 : vector<8x128xf32>
    %34 = vector.extract_strided_slice %14 {offsets = [0, 256], sizes = [8, 128], strides = [1, 1]} : vector<8x384xf32> to vector<8x128xf32>
    %35 = vector.extract_strided_slice %17 {offsets = [0, 256], sizes = [8, 128], strides = [1, 1]} : vector<8x384xf32> to vector<8x128xf32>
    %36 = arith.addf %35, %11 : vector<8x128xf32>
    %37 = arith.mulf %25, %36 : vector<8x128xf32>
    %38 = arith.addf %34, %37 : vector<8x128xf32>
    %39 = math.tanh %38 : vector<8x128xf32>
    %cst_20 = arith.constant 1.000000e+00 : f32
    %40 = vector.broadcast %cst_20 : f32 to vector<8x128xf32>
    %41 = arith.subf %40, %33 : vector<8x128xf32>
    %42 = arith.mulf %41, %39 : vector<8x128xf32>
    %43 = arith.mulf %33, %12 : vector<8x128xf32>
    %44 = arith.addf %42, %43 : vector<8x128xf32>
    %c0_21 = arith.constant 0 : index
    %c0_22 = arith.constant 0 : index
    %c0_23 = arith.constant 0 : index
    %45 = vector.load %arg13[%c0_21, %c0_22, %c0_23] : memref<8x8x128xf32, #tpu.memory_space<vmem>>, vector<1x8x128xf32>
    %46 = vector.shape_cast %45 : vector<1x8x128xf32> to vector<8x128xf32>
    %47 = vector.shape_cast %44 : vector<8x128xf32> to vector<1x8x128xf32>
    tpu.vector_store %arg13[%c0_21, %c0_22, %c0_23], %47 {strides = array<i32>} : memref<8x8x128xf32, #tpu.memory_space<vmem>>, vector<1x8x128xf32>,
    %c1 = arith.constant 1 : index
    %c0_24 = arith.constant 0 : index
    %c0_25 = arith.constant 0 : index
    %48 = vector.load %arg12[%c1, %c0_24, %c0_25] : memref<8x8x384xf32, #tpu.memory_space<vmem>>, vector<1x8x384xf32>
    %49 = vector.shape_cast %48 : vector<1x8x384xf32> to vector<8x384xf32>
    %50 = arith.truncf %44 : vector<8x128xf32> to vector<8x128xbf16>
    %c0_26 = arith.constant 0 : index
    %c0_27 = arith.constant 0 : index
    %51 = vector.load %arg3[%c0_26, %c0_27] : memref<128x384xbf16, #tpu.memory_space<vmem>>, vector<128x384xbf16>
    %cst_28 = arith.constant dense<0.000000e+00> : vector<8x384xf32>
    %52 = tpu.matmul %50, %51, %cst_28 {dimension_numbers = #tpu.dot_dimension_numbers<[1], [0], [0], [1], [0, 0, 1, 1], [], []>} : vector<8x128xbf16>, vector<128x384xbf16>, vector<8x384xf32> -> vector<8x384xf32>
    %53 = vector.extract_strided_slice %49 {offsets = [0, 0], sizes = [8, 128], strides = [1, 1]} : vector<8x384xf32> to vector<8x128xf32>
    %54 = vector.extract_strided_slice %52 {offsets = [0, 0], sizes = [8, 128], strides = [1, 1]} : vector<8x384xf32> to vector<8x128xf32>
    %55 = arith.addf %53, %54 : vector<8x128xf32>
    %56 = arith.negf %55 : vector<8x128xf32>
    %57 = math.exp %56 : vector<8x128xf32>
    %cst_29 = arith.constant 1.000000e+00 : f32
    %58 = vector.broadcast %cst_29 : f32 to vector<8x128xf32>
    %59 = arith.addf %58, %57 : vector<8x128xf32>
    %60 = arith.divf %58, %59 : vector<8x128xf32>
    %61 = vector.extract_strided_slice %49 {offsets = [0, 128], sizes = [8, 128], strides = [1, 1]} : vector<8x384xf32> to vector<8x128xf32>
    %62 = vector.extract_strided_slice %52 {offsets = [0, 128], sizes = [8, 128], strides = [1, 1]} : vector<8x384xf32> to vector<8x128xf32>
    %63 = arith.addf %61, %62 : vector<8x128xf32>
    %64 = arith.negf %63 : vector<8x128xf32>
    %65 = math.exp %64 : vector<8x128xf32>
    %cst_30 = arith.constant 1.000000e+00 : f32
    %66 = vector.broadcast %cst_30 : f32 to vector<8x128xf32>
    %67 = arith.addf %66, %65 : vector<8x128xf32>
    %68 = arith.divf %66, %67 : vector<8x128xf32>
    %69 = vector.extract_strided_slice %49 {offsets = [0, 256], sizes = [8, 128], strides = [1, 1]} : vector<8x384xf32> to vector<8x128xf32>
    %70 = vector.extract_strided_slice %52 {offsets = [0, 256], sizes = [8, 128], strides = [1, 1]} : vector<8x384xf32> to vector<8x128xf32>
    %71 = arith.addf %70, %11 : vector<8x128xf32>
    %72 = arith.mulf %60, %71 : vector<8x128xf32>
    %73 = arith.addf %69, %72 : vector<8x128xf32>
    %74 = math.tanh %73 : vector<8x128xf32>
    %cst_31 = arith.constant 1.000000e+00 : f32
    %75 = vector.broadcast %cst_31 : f32 to vector<8x128xf32>
    %76 = arith.subf %75, %68 : vector<8x128xf32>
    %77 = arith.mulf %76, %74 : vector<8x128xf32>
    %78 = arith.mulf %68, %44 : vector<8x128xf32>
    %79 = arith.addf %77, %78 : vector<8x128xf32>
    %c1_32 = arith.constant 1 : index
    %c0_33 = arith.constant 0 : index
    %c0_34 = arith.constant 0 : index
    %80 = vector.load %arg13[%c1_32, %c0_33, %c0_34] : memref<8x8x128xf32, #tpu.memory_space<vmem>>, vector<1x8x128xf32>
    %81 = vector.shape_cast %80 : vector<1x8x128xf32> to vector<8x128xf32>
    %82 = vector.shape_cast %79 : vector<8x128xf32> to vector<1x8x128xf32>
    tpu.vector_store %arg13[%c1_32, %c0_33, %c0_34], %82 {strides = array<i32>} : memref<8x8x128xf32, #tpu.memory_space<vmem>>, vector<1x8x128xf32>,
    %c2 = arith.constant 2 : index
    %c0_35 = arith.constant 0 : index
    %c0_36 = arith.constant 0 : index
    %83 = vector.load %arg12[%c2, %c0_35, %c0_36] : memref<8x8x384xf32, #tpu.memory_space<vmem>>, vector<1x8x384xf32>
    %84 = vector.shape_cast %83 : vector<1x8x384xf32> to vector<8x384xf32>
    %85 = arith.truncf %79 : vector<8x128xf32> to vector<8x128xbf16>
    %c0_37 = arith.constant 0 : index
    %c0_38 = arith.constant 0 : index
    %86 = vector.load %arg3[%c0_37, %c0_38] : memref<128x384xbf16, #tpu.memory_space<vmem>>, vector<128x384xbf16>
    %cst_39 = arith.constant dense<0.000000e+00> : vector<8x384xf32>
    %87 = tpu.matmul %85, %86, %cst_39 {dimension_numbers = #tpu.dot_dimension_numbers<[1], [0], [0], [1], [0, 0, 1, 1], [], []>} : vector<8x128xbf16>, vector<128x384xbf16>, vector<8x384xf32> -> vector<8x384xf32>
    %88 = vector.extract_strided_slice %84 {offsets = [0, 0], sizes = [8, 128], strides = [1, 1]} : vector<8x384xf32> to vector<8x128xf32>
    %89 = vector.extract_strided_slice %87 {offsets = [0, 0], sizes = [8, 128], strides = [1, 1]} : vector<8x384xf32> to vector<8x128xf32>
    %90 = arith.addf %88, %89 : vector<8x128xf32>
    %91 = arith.negf %90 : vector<8x128xf32>
    %92 = math.exp %91 : vector<8x128xf32>
    %cst_40 = arith.constant 1.000000e+00 : f32
    %93 = vector.broadcast %cst_40 : f32 to vector<8x128xf32>
    %94 = arith.addf %93, %92 : vector<8x128xf32>
    %95 = arith.divf %93, %94 : vector<8x128xf32>
    %96 = vector.extract_strided_slice %84 {offsets = [0, 128], sizes = [8, 128], strides = [1, 1]} : vector<8x384xf32> to vector<8x128xf32>
    %97 = vector.extract_strided_slice %87 {offsets = [0, 128], sizes = [8, 128], strides = [1, 1]} : vector<8x384xf32> to vector<8x128xf32>
    %98 = arith.addf %96, %97 : vector<8x128xf32>
    %99 = arith.negf %98 : vector<8x128xf32>
    %100 = math.exp %99 : vector<8x128xf32>
    %cst_41 = arith.constant 1.000000e+00 : f32
    %101 = vector.broadcast %cst_41 : f32 to vector<8x128xf32>
    %102 = arith.addf %101, %100 : vector<8x128xf32>
    %103 = arith.divf %101, %102 : vector<8x128xf32>
    %104 = vector.extract_strided_slice %84 {offsets = [0, 256], sizes = [8, 128], strides = [1, 1]} : vector<8x384xf32> to vector<8x128xf32>
    %105 = vector.extract_strided_slice %87 {offsets = [0, 256], sizes = [8, 128], strides = [1, 1]} : vector<8x384xf32> to vector<8x128xf32>
    %106 = arith.addf %105, %11 : vector<8x128xf32>
    %107 = arith.mulf %95, %106 : vector<8x128xf32>
    %108 = arith.addf %104, %107 : vector<8x128xf32>
    %109 = math.tanh %108 : vector<8x128xf32>
    %cst_42 = arith.constant 1.000000e+00 : f32
    %110 = vector.broadcast %cst_42 : f32 to vector<8x128xf32>
    %111 = arith.subf %110, %103 : vector<8x128xf32>
    %112 = arith.mulf %111, %109 : vector<8x128xf32>
    %113 = arith.mulf %103, %79 : vector<8x128xf32>
    %114 = arith.addf %112, %113 : vector<8x128xf32>
    %c2_43 = arith.constant 2 : index
    %c0_44 = arith.constant 0 : index
    %c0_45 = arith.constant 0 : index
    %115 = vector.load %arg13[%c2_43, %c0_44, %c0_45] : memref<8x8x128xf32, #tpu.memory_space<vmem>>, vector<1x8x128xf32>
    %116 = vector.shape_cast %115 : vector<1x8x128xf32> to vector<8x128xf32>
    %117 = vector.shape_cast %114 : vector<8x128xf32> to vector<1x8x128xf32>
    tpu.vector_store %arg13[%c2_43, %c0_44, %c0_45], %117 {strides = array<i32>} : memref<8x8x128xf32, #tpu.memory_space<vmem>>, vector<1x8x128xf32>,
    %c3 = arith.constant 3 : index
    %c0_46 = arith.constant 0 : index
    %c0_47 = arith.constant 0 : index
    %118 = vector.load %arg12[%c3, %c0_46, %c0_47] : memref<8x8x384xf32, #tpu.memory_space<vmem>>, vector<1x8x384xf32>
    %119 = vector.shape_cast %118 : vector<1x8x384xf32> to vector<8x384xf32>
    %120 = arith.truncf %114 : vector<8x128xf32> to vector<8x128xbf16>
    %c0_48 = arith.constant 0 : index
    %c0_49 = arith.constant 0 : index
    %121 = vector.load %arg3[%c0_48, %c0_49] : memref<128x384xbf16, #tpu.memory_space<vmem>>, vector<128x384xbf16>
    %cst_50 = arith.constant dense<0.000000e+00> : vector<8x384xf32>
    %122 = tpu.matmul %120, %121, %cst_50 {dimension_numbers = #tpu.dot_dimension_numbers<[1], [0], [0], [1], [0, 0, 1, 1], [], []>} : vector<8x128xbf16>, vector<128x384xbf16>, vector<8x384xf32> -> vector<8x384xf32>
    %123 = vector.extract_strided_slice %119 {offsets = [0, 0], sizes = [8, 128], strides = [1, 1]} : vector<8x384xf32> to vector<8x128xf32>
    %124 = vector.extract_strided_slice %122 {offsets = [0, 0], sizes = [8, 128], strides = [1, 1]} : vector<8x384xf32> to vector<8x128xf32>
    %125 = arith.addf %123, %124 : vector<8x128xf32>
    %126 = arith.negf %125 : vector<8x128xf32>
    %127 = math.exp %126 : vector<8x128xf32>
    %cst_51 = arith.constant 1.000000e+00 : f32
    %128 = vector.broadcast %cst_51 : f32 to vector<8x128xf32>
    %129 = arith.addf %128, %127 : vector<8x128xf32>
    %130 = arith.divf %128, %129 : vector<8x128xf32>
    %131 = vector.extract_strided_slice %119 {offsets = [0, 128], sizes = [8, 128], strides = [1, 1]} : vector<8x384xf32> to vector<8x128xf32>
    %132 = vector.extract_strided_slice %122 {offsets = [0, 128], sizes = [8, 128], strides = [1, 1]} : vector<8x384xf32> to vector<8x128xf32>
    %133 = arith.addf %131, %132 : vector<8x128xf32>
    %134 = arith.negf %133 : vector<8x128xf32>
    %135 = math.exp %134 : vector<8x128xf32>
    %cst_52 = arith.constant 1.000000e+00 : f32
    %136 = vector.broadcast %cst_52 : f32 to vector<8x128xf32>
    %137 = arith.addf %136, %135 : vector<8x128xf32>
    %138 = arith.divf %136, %137 : vector<8x128xf32>
    %139 = vector.extract_strided_slice %119 {offsets = [0, 256], sizes = [8, 128], strides = [1, 1]} : vector<8x384xf32> to vector<8x128xf32>
    %140 = vector.extract_strided_slice %122 {offsets = [0, 256], sizes = [8, 128], strides = [1, 1]} : vector<8x384xf32> to vector<8x128xf32>
    %141 = arith.addf %140, %11 : vector<8x128xf32>
    %142 = arith.mulf %130, %141 : vector<8x128xf32>
    %143 = arith.addf %139, %142 : vector<8x128xf32>
    %144 = math.tanh %143 : vector<8x128xf32>
    %cst_53 = arith.constant 1.000000e+00 : f32
    %145 = vector.broadcast %cst_53 : f32 to vector<8x128xf32>
    %146 = arith.subf %145, %138 : vector<8x128xf32>
    %147 = arith.mulf %146, %144 : vector<8x128xf32>
    %148 = arith.mulf %138, %114 : vector<8x128xf32>
    %149 = arith.addf %147, %148 : vector<8x128xf32>
    %c3_54 = arith.constant 3 : index
    %c0_55 = arith.constant 0 : index
    %c0_56 = arith.constant 0 : index
    %150 = vector.load %arg13[%c3_54, %c0_55, %c0_56] : memref<8x8x128xf32, #tpu.memory_space<vmem>>, vector<1x8x128xf32>
    %151 = vector.shape_cast %150 : vector<1x8x128xf32> to vector<8x128xf32>
    %152 = vector.shape_cast %149 : vector<8x128xf32> to vector<1x8x128xf32>
    tpu.vector_store %arg13[%c3_54, %c0_55, %c0_56], %152 {strides = array<i32>} : memref<8x8x128xf32, #tpu.memory_space<vmem>>, vector<1x8x128xf32>,
    %c4 = arith.constant 4 : index
    %c0_57 = arith.constant 0 : index
    %c0_58 = arith.constant 0 : index
    %153 = vector.load %arg12[%c4, %c0_57, %c0_58] : memref<8x8x384xf32, #tpu.memory_space<vmem>>, vector<1x8x384xf32>
    %154 = vector.shape_cast %153 : vector<1x8x384xf32> to vector<8x384xf32>
    %155 = arith.truncf %149 : vector<8x128xf32> to vector<8x128xbf16>
    %c0_59 = arith.constant 0 : index
    %c0_60 = arith.constant 0 : index
    %156 = vector.load %arg3[%c0_59, %c0_60] : memref<128x384xbf16, #tpu.memory_space<vmem>>, vector<128x384xbf16>
    %cst_61 = arith.constant dense<0.000000e+00> : vector<8x384xf32>
    %157 = tpu.matmul %155, %156, %cst_61 {dimension_numbers = #tpu.dot_dimension_numbers<[1], [0], [0], [1], [0, 0, 1, 1], [], []>} : vector<8x128xbf16>, vector<128x384xbf16>, vector<8x384xf32> -> vector<8x384xf32>
    %158 = vector.extract_strided_slice %154 {offsets = [0, 0], sizes = [8, 128], strides = [1, 1]} : vector<8x384xf32> to vector<8x128xf32>
    %159 = vector.extract_strided_slice %157 {offsets = [0, 0], sizes = [8, 128], strides = [1, 1]} : vector<8x384xf32> to vector<8x128xf32>
    %160 = arith.addf %158, %159 : vector<8x128xf32>
    %161 = arith.negf %160 : vector<8x128xf32>
    %162 = math.exp %161 : vector<8x128xf32>
    %cst_62 = arith.constant 1.000000e+00 : f32
    %163 = vector.broadcast %cst_62 : f32 to vector<8x128xf32>
    %164 = arith.addf %163, %162 : vector<8x128xf32>
    %165 = arith.divf %163, %164 : vector<8x128xf32>
    %166 = vector.extract_strided_slice %154 {offsets = [0, 128], sizes = [8, 128], strides = [1, 1]} : vector<8x384xf32> to vector<8x128xf32>
    %167 = vector.extract_strided_slice %157 {offsets = [0, 128], sizes = [8, 128], strides = [1, 1]} : vector<8x384xf32> to vector<8x128xf32>
    %168 = arith.addf %166, %167 : vector<8x128xf32>
    %169 = arith.negf %168 : vector<8x128xf32>
    %170 = math.exp %169 : vector<8x128xf32>
    %cst_63 = arith.constant 1.000000e+00 : f32
    %171 = vector.broadcast %cst_63 : f32 to vector<8x128xf32>
    %172 = arith.addf %171, %170 : vector<8x128xf32>
    %173 = arith.divf %171, %172 : vector<8x128xf32>
    %174 = vector.extract_strided_slice %154 {offsets = [0, 256], sizes = [8, 128], strides = [1, 1]} : vector<8x384xf32> to vector<8x128xf32>
    %175 = vector.extract_strided_slice %157 {offsets = [0, 256], sizes = [8, 128], strides = [1, 1]} : vector<8x384xf32> to vector<8x128xf32>
    %176 = arith.addf %175, %11 : vector<8x128xf32>
    %177 = arith.mulf %165, %176 : vector<8x128xf32>
    %178 = arith.addf %174, %177 : vector<8x128xf32>
    %179 = math.tanh %178 : vector<8x128xf32>
    %cst_64 = arith.constant 1.000000e+00 : f32
    %180 = vector.broadcast %cst_64 : f32 to vector<8x128xf32>
    %181 = arith.subf %180, %173 : vector<8x128xf32>
    %182 = arith.mulf %181, %179 : vector<8x128xf32>
    %183 = arith.mulf %173, %149 : vector<8x128xf32>
    %184 = arith.addf %182, %183 : vector<8x128xf32>
    %c4_65 = arith.constant 4 : index
    %c0_66 = arith.constant 0 : index
    %c0_67 = arith.constant 0 : index
    %185 = vector.load %arg13[%c4_65, %c0_66, %c0_67] : memref<8x8x128xf32, #tpu.memory_space<vmem>>, vector<1x8x128xf32>
    %186 = vector.shape_cast %185 : vector<1x8x128xf32> to vector<8x128xf32>
    %187 = vector.shape_cast %184 : vector<8x128xf32> to vector<1x8x128xf32>
    tpu.vector_store %arg13[%c4_65, %c0_66, %c0_67], %187 {strides = array<i32>} : memref<8x8x128xf32, #tpu.memory_space<vmem>>, vector<1x8x128xf32>,
    %c5 = arith.constant 5 : index
    %c0_68 = arith.constant 0 : index
    %c0_69 = arith.constant 0 : index
    %188 = vector.load %arg12[%c5, %c0_68, %c0_69] : memref<8x8x384xf32, #tpu.memory_space<vmem>>, vector<1x8x384xf32>
    %189 = vector.shape_cast %188 : vector<1x8x384xf32> to vector<8x384xf32>
    %190 = arith.truncf %184 : vector<8x128xf32> to vector<8x128xbf16>
    %c0_70 = arith.constant 0 : index
    %c0_71 = arith.constant 0 : index
    %191 = vector.load %arg3[%c0_70, %c0_71] : memref<128x384xbf16, #tpu.memory_space<vmem>>, vector<128x384xbf16>
    %cst_72 = arith.constant dense<0.000000e+00> : vector<8x384xf32>
    %192 = tpu.matmul %190, %191, %cst_72 {dimension_numbers = #tpu.dot_dimension_numbers<[1], [0], [0], [1], [0, 0, 1, 1], [], []>} : vector<8x128xbf16>, vector<128x384xbf16>, vector<8x384xf32> -> vector<8x384xf32>
    %193 = vector.extract_strided_slice %189 {offsets = [0, 0], sizes = [8, 128], strides = [1, 1]} : vector<8x384xf32> to vector<8x128xf32>
    %194 = vector.extract_strided_slice %192 {offsets = [0, 0], sizes = [8, 128], strides = [1, 1]} : vector<8x384xf32> to vector<8x128xf32>
    %195 = arith.addf %193, %194 : vector<8x128xf32>
    %196 = arith.negf %195 : vector<8x128xf32>
    %197 = math.exp %196 : vector<8x128xf32>
    %cst_73 = arith.constant 1.000000e+00 : f32
    %198 = vector.broadcast %cst_73 : f32 to vector<8x128xf32>
    %199 = arith.addf %198, %197 : vector<8x128xf32>
    %200 = arith.divf %198, %199 : vector<8x128xf32>
    %201 = vector.extract_strided_slice %189 {offsets = [0, 128], sizes = [8, 128], strides = [1, 1]} : vector<8x384xf32> to vector<8x128xf32>
    %202 = vector.extract_strided_slice %192 {offsets = [0, 128], sizes = [8, 128], strides = [1, 1]} : vector<8x384xf32> to vector<8x128xf32>
    %203 = arith.addf %201, %202 : vector<8x128xf32>
    %204 = arith.negf %203 : vector<8x128xf32>
    %205 = math.exp %204 : vector<8x128xf32>
    %cst_74 = arith.constant 1.000000e+00 : f32
    %206 = vector.broadcast %cst_74 : f32 to vector<8x128xf32>
    %207 = arith.addf %206, %205 : vector<8x128xf32>
    %208 = arith.divf %206, %207 : vector<8x128xf32>
    %209 = vector.extract_strided_slice %189 {offsets = [0, 256], sizes = [8, 128], strides = [1, 1]} : vector<8x384xf32> to vector<8x128xf32>
    %210 = vector.extract_strided_slice %192 {offsets = [0, 256], sizes = [8, 128], strides = [1, 1]} : vector<8x384xf32> to vector<8x128xf32>
    %211 = arith.addf %210, %11 : vector<8x128xf32>
    %212 = arith.mulf %200, %211 : vector<8x128xf32>
    %213 = arith.addf %209, %212 : vector<8x128xf32>
    %214 = math.tanh %213 : vector<8x128xf32>
    %cst_75 = arith.constant 1.000000e+00 : f32
    %215 = vector.broadcast %cst_75 : f32 to vector<8x128xf32>
    %216 = arith.subf %215, %208 : vector<8x128xf32>
    %217 = arith.mulf %216, %214 : vector<8x128xf32>
    %218 = arith.mulf %208, %184 : vector<8x128xf32>
    %219 = arith.addf %217, %218 : vector<8x128xf32>
    %c5_76 = arith.constant 5 : index
    %c0_77 = arith.constant 0 : index
    %c0_78 = arith.constant 0 : index
    %220 = vector.load %arg13[%c5_76, %c0_77, %c0_78] : memref<8x8x128xf32, #tpu.memory_space<vmem>>, vector<1x8x128xf32>
    %221 = vector.shape_cast %220 : vector<1x8x128xf32> to vector<8x128xf32>
    %222 = vector.shape_cast %219 : vector<8x128xf32> to vector<1x8x128xf32>
    tpu.vector_store %arg13[%c5_76, %c0_77, %c0_78], %222 {strides = array<i32>} : memref<8x8x128xf32, #tpu.memory_space<vmem>>, vector<1x8x128xf32>,
    %c6 = arith.constant 6 : index
    %c0_79 = arith.constant 0 : index
    %c0_80 = arith.constant 0 : index
    %223 = vector.load %arg12[%c6, %c0_79, %c0_80] : memref<8x8x384xf32, #tpu.memory_space<vmem>>, vector<1x8x384xf32>
    %224 = vector.shape_cast %223 : vector<1x8x384xf32> to vector<8x384xf32>
    %225 = arith.truncf %219 : vector<8x128xf32> to vector<8x128xbf16>
    %c0_81 = arith.constant 0 : index
    %c0_82 = arith.constant 0 : index
    %226 = vector.load %arg3[%c0_81, %c0_82] : memref<128x384xbf16, #tpu.memory_space<vmem>>, vector<128x384xbf16>
    %cst_83 = arith.constant dense<0.000000e+00> : vector<8x384xf32>
    %227 = tpu.matmul %225, %226, %cst_83 {dimension_numbers = #tpu.dot_dimension_numbers<[1], [0], [0], [1], [0, 0, 1, 1], [], []>} : vector<8x128xbf16>, vector<128x384xbf16>, vector<8x384xf32> -> vector<8x384xf32>
    %228 = vector.extract_strided_slice %224 {offsets = [0, 0], sizes = [8, 128], strides = [1, 1]} : vector<8x384xf32> to vector<8x128xf32>
    %229 = vector.extract_strided_slice %227 {offsets = [0, 0], sizes = [8, 128], strides = [1, 1]} : vector<8x384xf32> to vector<8x128xf32>
    %230 = arith.addf %228, %229 : vector<8x128xf32>
    %231 = arith.negf %230 : vector<8x128xf32>
    %232 = math.exp %231 : vector<8x128xf32>
    %cst_84 = arith.constant 1.000000e+00 : f32
    %233 = vector.broadcast %cst_84 : f32 to vector<8x128xf32>
    %234 = arith.addf %233, %232 : vector<8x128xf32>
    %235 = arith.divf %233, %234 : vector<8x128xf32>
    %236 = vector.extract_strided_slice %224 {offsets = [0, 128], sizes = [8, 128], strides = [1, 1]} : vector<8x384xf32> to vector<8x128xf32>
    %237 = vector.extract_strided_slice %227 {offsets = [0, 128], sizes = [8, 128], strides = [1, 1]} : vector<8x384xf32> to vector<8x128xf32>
    %238 = arith.addf %236, %237 : vector<8x128xf32>
    %239 = arith.negf %238 : vector<8x128xf32>
    %240 = math.exp %239 : vector<8x128xf32>
    %cst_85 = arith.constant 1.000000e+00 : f32
    %241 = vector.broadcast %cst_85 : f32 to vector<8x128xf32>
    %242 = arith.addf %241, %240 : vector<8x128xf32>
    %243 = arith.divf %241, %242 : vector<8x128xf32>
    %244 = vector.extract_strided_slice %224 {offsets = [0, 256], sizes = [8, 128], strides = [1, 1]} : vector<8x384xf32> to vector<8x128xf32>
    %245 = vector.extract_strided_slice %227 {offsets = [0, 256], sizes = [8, 128], strides = [1, 1]} : vector<8x384xf32> to vector<8x128xf32>
    %246 = arith.addf %245, %11 : vector<8x128xf32>
    %247 = arith.mulf %235, %246 : vector<8x128xf32>
    %248 = arith.addf %244, %247 : vector<8x128xf32>
    %249 = math.tanh %248 : vector<8x128xf32>
    %cst_86 = arith.constant 1.000000e+00 : f32
    %250 = vector.broadcast %cst_86 : f32 to vector<8x128xf32>
    %251 = arith.subf %250, %243 : vector<8x128xf32>
    %252 = arith.mulf %251, %249 : vector<8x128xf32>
    %253 = arith.mulf %243, %219 : vector<8x128xf32>
    %254 = arith.addf %252, %253 : vector<8x128xf32>
    %c6_87 = arith.constant 6 : index
    %c0_88 = arith.constant 0 : index
    %c0_89 = arith.constant 0 : index
    %255 = vector.load %arg13[%c6_87, %c0_88, %c0_89] : memref<8x8x128xf32, #tpu.memory_space<vmem>>, vector<1x8x128xf32>
    %256 = vector.shape_cast %255 : vector<1x8x128xf32> to vector<8x128xf32>
    %257 = vector.shape_cast %254 : vector<8x128xf32> to vector<1x8x128xf32>
    tpu.vector_store %arg13[%c6_87, %c0_88, %c0_89], %257 {strides = array<i32>} : memref<8x8x128xf32, #tpu.memory_space<vmem>>, vector<1x8x128xf32>,
    %c7 = arith.constant 7 : index
    %c0_90 = arith.constant 0 : index
    %c0_91 = arith.constant 0 : index
    %258 = vector.load %arg12[%c7, %c0_90, %c0_91] : memref<8x8x384xf32, #tpu.memory_space<vmem>>, vector<1x8x384xf32>
    %259 = vector.shape_cast %258 : vector<1x8x384xf32> to vector<8x384xf32>
    %260 = arith.truncf %254 : vector<8x128xf32> to vector<8x128xbf16>
    %c0_92 = arith.constant 0 : index
    %c0_93 = arith.constant 0 : index
    %261 = vector.load %arg3[%c0_92, %c0_93] : memref<128x384xbf16, #tpu.memory_space<vmem>>, vector<128x384xbf16>
    %cst_94 = arith.constant dense<0.000000e+00> : vector<8x384xf32>
    %262 = tpu.matmul %260, %261, %cst_94 {dimension_numbers = #tpu.dot_dimension_numbers<[1], [0], [0], [1], [0, 0, 1, 1], [], []>} : vector<8x128xbf16>, vector<128x384xbf16>, vector<8x384xf32> -> vector<8x384xf32>
    %263 = vector.extract_strided_slice %259 {offsets = [0, 0], sizes = [8, 128], strides = [1, 1]} : vector<8x384xf32> to vector<8x128xf32>
    %264 = vector.extract_strided_slice %262 {offsets = [0, 0], sizes = [8, 128], strides = [1, 1]} : vector<8x384xf32> to vector<8x128xf32>
    %265 = arith.addf %263, %264 : vector<8x128xf32>
    %266 = arith.negf %265 : vector<8x128xf32>
    %267 = math.exp %266 : vector<8x128xf32>
    %cst_95 = arith.constant 1.000000e+00 : f32
    %268 = vector.broadcast %cst_95 : f32 to vector<8x128xf32>
    %269 = arith.addf %268, %267 : vector<8x128xf32>
    %270 = arith.divf %268, %269 : vector<8x128xf32>
    %271 = vector.extract_strided_slice %259 {offsets = [0, 128], sizes = [8, 128], strides = [1, 1]} : vector<8x384xf32> to vector<8x128xf32>
    %272 = vector.extract_strided_slice %262 {offsets = [0, 128], sizes = [8, 128], strides = [1, 1]} : vector<8x384xf32> to vector<8x128xf32>
    %273 = arith.addf %271, %272 : vector<8x128xf32>
    %274 = arith.negf %273 : vector<8x128xf32>
    %275 = math.exp %274 : vector<8x128xf32>
    %cst_96 = arith.constant 1.000000e+00 : f32
    %276 = vector.broadcast %cst_96 : f32 to vector<8x128xf32>
    %277 = arith.addf %276, %275 : vector<8x128xf32>
    %278 = arith.divf %276, %277 : vector<8x128xf32>
    %279 = vector.extract_strided_slice %259 {offsets = [0, 256], sizes = [8, 128], strides = [1, 1]} : vector<8x384xf32> to vector<8x128xf32>
    %280 = vector.extract_strided_slice %262 {offsets = [0, 256], sizes = [8, 128], strides = [1, 1]} : vector<8x384xf32> to vector<8x128xf32>
    %281 = arith.addf %280, %11 : vector<8x128xf32>
    %282 = arith.mulf %270, %281 : vector<8x128xf32>
    %283 = arith.addf %279, %282 : vector<8x128xf32>
    %284 = math.tanh %283 : vector<8x128xf32>
    %cst_97 = arith.constant 1.000000e+00 : f32
    %285 = vector.broadcast %cst_97 : f32 to vector<8x128xf32>
    %286 = arith.subf %285, %278 : vector<8x128xf32>
    %287 = arith.mulf %286, %284 : vector<8x128xf32>
    %288 = arith.mulf %278, %254 : vector<8x128xf32>
    %289 = arith.addf %287, %288 : vector<8x128xf32>
    %c7_98 = arith.constant 7 : index
    %c0_99 = arith.constant 0 : index
    %c0_100 = arith.constant 0 : index
    %290 = vector.load %arg13[%c7_98, %c0_99, %c0_100] : memref<8x8x128xf32, #tpu.memory_space<vmem>>, vector<1x8x128xf32>
    %291 = vector.shape_cast %290 : vector<1x8x128xf32> to vector<8x128xf32>
    %292 = vector.shape_cast %289 : vector<8x128xf32> to vector<1x8x128xf32>
    tpu.vector_store %arg13[%c7_98, %c0_99, %c0_100], %292 {strides = array<i32>} : memref<8x8x128xf32, #tpu.memory_space<vmem>>, vector<1x8x128xf32>,
    %293 = arith.truncf %289 : vector<8x128xf32> to vector<8x128xbf16>
    %c0_101 = arith.constant 0 : index
    %c0_102 = arith.constant 0 : index
    %294 = vector.load %arg6[%c0_101, %c0_102] : memref<128x128xbf16, #tpu.memory_space<vmem>>, vector<128x128xbf16>
    %cst_103 = arith.constant dense<0.000000e+00> : vector<8x128xf32>
    %295 = tpu.matmul %293, %294, %cst_103 {dimension_numbers = #tpu.dot_dimension_numbers<[1], [0], [0], [1], [0, 0, 1, 1], [], []>} : vector<8x128xbf16>, vector<128x128xbf16>, vector<8x128xf32> -> vector<8x128xf32>
    %c0_104 = arith.constant 0 : index
    %c0_105 = arith.constant 0 : index
    %c0_106 = arith.constant 0 : index
    %296 = vector.load %arg13[%c0_104, %c0_105, %c0_106] : memref<8x8x128xf32, #tpu.memory_space<vmem>>, vector<1x8x128xf32>
    %297 = vector.shape_cast %296 : vector<1x8x128xf32> to vector<8x128xf32>
    %298 = arith.mulf %297, %295 : vector<8x128xf32>
    %cst_107 = arith.constant dense<0.000000e+00> : vector<8xf32>
    %299 = vector.multi_reduction <add>, %298, %cst_107 [1] : vector<8x128xf32> to vector<8xf32>
    %300 = vector.shape_cast %299 : vector<8xf32> to vector<8x1xf32>
    %c1_108 = arith.constant 1 : index
    %c0_109 = arith.constant 0 : index
    %c0_110 = arith.constant 0 : index
    %301 = vector.load %arg13[%c1_108, %c0_109, %c0_110] : memref<8x8x128xf32, #tpu.memory_space<vmem>>, vector<1x8x128xf32>
    %302 = vector.shape_cast %301 : vector<1x8x128xf32> to vector<8x128xf32>
    %303 = arith.mulf %302, %295 : vector<8x128xf32>
    %cst_111 = arith.constant dense<0.000000e+00> : vector<8xf32>
    %304 = vector.multi_reduction <add>, %303, %cst_111 [1] : vector<8x128xf32> to vector<8xf32>
    %305 = vector.shape_cast %304 : vector<8xf32> to vector<8x1xf32>
    %c2_112 = arith.constant 2 : index
    %c0_113 = arith.constant 0 : index
    %c0_114 = arith.constant 0 : index
    %306 = vector.load %arg13[%c2_112, %c0_113, %c0_114] : memref<8x8x128xf32, #tpu.memory_space<vmem>>, vector<1x8x128xf32>
    %307 = vector.shape_cast %306 : vector<1x8x128xf32> to vector<8x128xf32>
    %308 = arith.mulf %307, %295 : vector<8x128xf32>
    %cst_115 = arith.constant dense<0.000000e+00> : vector<8xf32>
    %309 = vector.multi_reduction <add>, %308, %cst_115 [1] : vector<8x128xf32> to vector<8xf32>
    %310 = vector.shape_cast %309 : vector<8xf32> to vector<8x1xf32>
    %c3_116 = arith.constant 3 : index
    %c0_117 = arith.constant 0 : index
    %c0_118 = arith.constant 0 : index
    %311 = vector.load %arg13[%c3_116, %c0_117, %c0_118] : memref<8x8x128xf32, #tpu.memory_space<vmem>>, vector<1x8x128xf32>
    %312 = vector.shape_cast %311 : vector<1x8x128xf32> to vector<8x128xf32>
    %313 = arith.mulf %312, %295 : vector<8x128xf32>
    %cst_119 = arith.constant dense<0.000000e+00> : vector<8xf32>
    %314 = vector.multi_reduction <add>, %313, %cst_119 [1] : vector<8x128xf32> to vector<8xf32>
    %315 = vector.shape_cast %314 : vector<8xf32> to vector<8x1xf32>
    %c4_120 = arith.constant 4 : index
    %c0_121 = arith.constant 0 : index
    %c0_122 = arith.constant 0 : index
    %316 = vector.load %arg13[%c4_120, %c0_121, %c0_122] : memref<8x8x128xf32, #tpu.memory_space<vmem>>, vector<1x8x128xf32>
    %317 = vector.shape_cast %316 : vector<1x8x128xf32> to vector<8x128xf32>
    %318 = arith.mulf %317, %295 : vector<8x128xf32>
    %cst_123 = arith.constant dense<0.000000e+00> : vector<8xf32>
    %319 = vector.multi_reduction <add>, %318, %cst_123 [1] : vector<8x128xf32> to vector<8xf32>
    %320 = vector.shape_cast %319 : vector<8xf32> to vector<8x1xf32>
    %c5_124 = arith.constant 5 : index
    %c0_125 = arith.constant 0 : index
    %c0_126 = arith.constant 0 : index
    %321 = vector.load %arg13[%c5_124, %c0_125, %c0_126] : memref<8x8x128xf32, #tpu.memory_space<vmem>>, vector<1x8x128xf32>
    %322 = vector.shape_cast %321 : vector<1x8x128xf32> to vector<8x128xf32>
    %323 = arith.mulf %322, %295 : vector<8x128xf32>
    %cst_127 = arith.constant dense<0.000000e+00> : vector<8xf32>
    %324 = vector.multi_reduction <add>, %323, %cst_127 [1] : vector<8x128xf32> to vector<8xf32>
    %325 = vector.shape_cast %324 : vector<8xf32> to vector<8x1xf32>
    %c6_128 = arith.constant 6 : index
    %c0_129 = arith.constant 0 : index
    %c0_130 = arith.constant 0 : index
    %326 = vector.load %arg13[%c6_128, %c0_129, %c0_130] : memref<8x8x128xf32, #tpu.memory_space<vmem>>, vector<1x8x128xf32>
    %327 = vector.shape_cast %326 : vector<1x8x128xf32> to vector<8x128xf32>
    %328 = arith.mulf %327, %295 : vector<8x128xf32>
    %cst_131 = arith.constant dense<0.000000e+00> : vector<8xf32>
    %329 = vector.multi_reduction <add>, %328, %cst_131 [1] : vector<8x128xf32> to vector<8xf32>
    %330 = vector.shape_cast %329 : vector<8xf32> to vector<8x1xf32>
    %c7_132 = arith.constant 7 : index
    %c0_133 = arith.constant 0 : index
    %c0_134 = arith.constant 0 : index
    %331 = vector.load %arg13[%c7_132, %c0_133, %c0_134] : memref<8x8x128xf32, #tpu.memory_space<vmem>>, vector<1x8x128xf32>
    %332 = vector.shape_cast %331 : vector<1x8x128xf32> to vector<8x128xf32>
    %333 = arith.mulf %332, %295 : vector<8x128xf32>
    %cst_135 = arith.constant dense<0.000000e+00> : vector<8xf32>
    %334 = vector.multi_reduction <add>, %333, %cst_135 [1] : vector<8x128xf32> to vector<8xf32>
    %335 = vector.shape_cast %334 : vector<8xf32> to vector<8x1xf32>
    %336 = arith.maximumf %300, %305 : vector<8x1xf32>
    %337 = arith.maximumf %336, %310 : vector<8x1xf32>
    %338 = arith.maximumf %337, %315 : vector<8x1xf32>
    %339 = arith.maximumf %338, %320 : vector<8x1xf32>
    %340 = arith.maximumf %339, %325 : vector<8x1xf32>
    %341 = arith.maximumf %340, %330 : vector<8x1xf32>
    %342 = arith.maximumf %341, %335 : vector<8x1xf32>
    %343 = arith.subf %300, %342 : vector<8x1xf32>
    %344 = math.exp %343 : vector<8x1xf32>
    %345 = arith.subf %305, %342 : vector<8x1xf32>
    %346 = math.exp %345 : vector<8x1xf32>
    %347 = arith.subf %310, %342 : vector<8x1xf32>
    %348 = math.exp %347 : vector<8x1xf32>
    %349 = arith.subf %315, %342 : vector<8x1xf32>
    %350 = math.exp %349 : vector<8x1xf32>
    %351 = arith.subf %320, %342 : vector<8x1xf32>
    %352 = math.exp %351 : vector<8x1xf32>
    %353 = arith.subf %325, %342 : vector<8x1xf32>
    %354 = math.exp %353 : vector<8x1xf32>
    %355 = arith.subf %330, %342 : vector<8x1xf32>
    %356 = math.exp %355 : vector<8x1xf32>
    %357 = arith.subf %335, %342 : vector<8x1xf32>
    %358 = math.exp %357 : vector<8x1xf32>
    %359 = arith.addf %344, %346 : vector<8x1xf32>
    %360 = arith.addf %359, %348 : vector<8x1xf32>
    %361 = arith.addf %360, %350 : vector<8x1xf32>
    %362 = arith.addf %361, %352 : vector<8x1xf32>
    %363 = arith.addf %362, %354 : vector<8x1xf32>
    %364 = arith.addf %363, %356 : vector<8x1xf32>
    %365 = arith.addf %364, %358 : vector<8x1xf32>
    %366 = tpu.reciprocal %365 {approx = true} : vector<8x1xf32> -> vector<8x1xf32>
    %c0_136 = arith.constant 0 : index
    %c0_137 = arith.constant 0 : index
    %367 = vector.load %arg9[%c0_136, %c0_137] : memref<8x1xf32, #tpu.memory_space<vmem>>, vector<8x1xf32>
    %c0_138 = arith.constant 0 : index
    %c0_139 = arith.constant 0 : index
    %368 = vector.load %arg10[%c0_138, %c0_139] : memref<8x1xf32, #tpu.memory_space<vmem>>, vector<8x1xf32>
    %cst_140 = arith.constant 0.000000e+00 : f32
    %369 = vector.broadcast %cst_140 : f32 to vector<8x128xf32>
    %c0_141 = arith.constant 0 : index
    %c0_142 = arith.constant 0 : index
    %c0_143 = arith.constant 0 : index
    %370 = vector.load %arg13[%c0_141, %c0_142, %c0_143] : memref<8x8x128xf32, #tpu.memory_space<vmem>>, vector<1x8x128xf32>
    %371 = vector.shape_cast %370 : vector<1x8x128xf32> to vector<8x128xf32>
    %372 = arith.mulf %344, %366 : vector<8x1xf32>
    %373 = vector.broadcast %372 : vector<8x1xf32> to vector<8x128xf32>
    %374 = arith.mulf %373, %371 : vector<8x128xf32>
    %cst_144 = arith.constant -7.000000e+00 : f32
    %375 = vector.broadcast %cst_144 : f32 to vector<8x1xf32>
    %376 = arith.mulf %368, %375 : vector<8x1xf32>
    %377 = math.exp %376 : vector<8x1xf32>
    %378 = arith.mulf %367, %377 : vector<8x1xf32>
    %379 = arith.addf %369, %374 : vector<8x128xf32>
    %380 = vector.broadcast %378 : vector<8x1xf32> to vector<8x128xf32>
    %381 = arith.mulf %380, %374 : vector<8x128xf32>
    %cst_145 = arith.constant 0.000000e+00 : f32
    %382 = vector.broadcast %cst_145 : f32 to vector<8x128xf32>
    %383 = arith.maximumf %381, %382 : vector<8x128xf32>
    %384 = arith.addf %379, %383 : vector<8x128xf32>
    %c1_146 = arith.constant 1 : index
    %c0_147 = arith.constant 0 : index
    %c0_148 = arith.constant 0 : index
    %385 = vector.load %arg13[%c1_146, %c0_147, %c0_148] : memref<8x8x128xf32, #tpu.memory_space<vmem>>, vector<1x8x128xf32>
    %386 = vector.shape_cast %385 : vector<1x8x128xf32> to vector<8x128xf32>
    %387 = arith.mulf %346, %366 : vector<8x1xf32>
    %388 = vector.broadcast %387 : vector<8x1xf32> to vector<8x128xf32>
    %389 = arith.mulf %388, %386 : vector<8x128xf32>
    %cst_149 = arith.constant -6.000000e+00 : f32
    %390 = vector.broadcast %cst_149 : f32 to vector<8x1xf32>
    %391 = arith.mulf %368, %390 : vector<8x1xf32>
    %392 = math.exp %391 : vector<8x1xf32>
    %393 = arith.mulf %367, %392 : vector<8x1xf32>
    %394 = arith.addf %384, %389 : vector<8x128xf32>
    %395 = vector.broadcast %393 : vector<8x1xf32> to vector<8x128xf32>
    %396 = arith.mulf %395, %389 : vector<8x128xf32>
    %cst_150 = arith.constant 0.000000e+00 : f32
    %397 = vector.broadcast %cst_150 : f32 to vector<8x128xf32>
    %398 = arith.maximumf %396, %397 : vector<8x128xf32>
    %399 = arith.addf %394, %398 : vector<8x128xf32>
    %c2_151 = arith.constant 2 : index
    %c0_152 = arith.constant 0 : index
    %c0_153 = arith.constant 0 : index
    %400 = vector.load %arg13[%c2_151, %c0_152, %c0_153] : memref<8x8x128xf32, #tpu.memory_space<vmem>>, vector<1x8x128xf32>
    %401 = vector.shape_cast %400 : vector<1x8x128xf32> to vector<8x128xf32>
    %402 = arith.mulf %348, %366 : vector<8x1xf32>
    %403 = vector.broadcast %402 : vector<8x1xf32> to vector<8x128xf32>
    %404 = arith.mulf %403, %401 : vector<8x128xf32>
    %cst_154 = arith.constant -5.000000e+00 : f32
    %405 = vector.broadcast %cst_154 : f32 to vector<8x1xf32>
    %406 = arith.mulf %368, %405 : vector<8x1xf32>
    %407 = math.exp %406 : vector<8x1xf32>
    %408 = arith.mulf %367, %407 : vector<8x1xf32>
    %409 = arith.addf %399, %404 : vector<8x128xf32>
    %410 = vector.broadcast %408 : vector<8x1xf32> to vector<8x128xf32>
    %411 = arith.mulf %410, %404 : vector<8x128xf32>
    %cst_155 = arith.constant 0.000000e+00 : f32
    %412 = vector.broadcast %cst_155 : f32 to vector<8x128xf32>
    %413 = arith.maximumf %411, %412 : vector<8x128xf32>
    %414 = arith.addf %409, %413 : vector<8x128xf32>
    %c3_156 = arith.constant 3 : index
    %c0_157 = arith.constant 0 : index
    %c0_158 = arith.constant 0 : index
    %415 = vector.load %arg13[%c3_156, %c0_157, %c0_158] : memref<8x8x128xf32, #tpu.memory_space<vmem>>, vector<1x8x128xf32>
    %416 = vector.shape_cast %415 : vector<1x8x128xf32> to vector<8x128xf32>
    %417 = arith.mulf %350, %366 : vector<8x1xf32>
    %418 = vector.broadcast %417 : vector<8x1xf32> to vector<8x128xf32>
    %419 = arith.mulf %418, %416 : vector<8x128xf32>
    %cst_159 = arith.constant -4.000000e+00 : f32
    %420 = vector.broadcast %cst_159 : f32 to vector<8x1xf32>
    %421 = arith.mulf %368, %420 : vector<8x1xf32>
    %422 = math.exp %421 : vector<8x1xf32>
    %423 = arith.mulf %367, %422 : vector<8x1xf32>
    %424 = arith.addf %414, %419 : vector<8x128xf32>
    %425 = vector.broadcast %423 : vector<8x1xf32> to vector<8x128xf32>
    %426 = arith.mulf %425, %419 : vector<8x128xf32>
    %cst_160 = arith.constant 0.000000e+00 : f32
    %427 = vector.broadcast %cst_160 : f32 to vector<8x128xf32>
    %428 = arith.maximumf %426, %427 : vector<8x128xf32>
    %429 = arith.addf %424, %428 : vector<8x128xf32>
    %c4_161 = arith.constant 4 : index
    %c0_162 = arith.constant 0 : index
    %c0_163 = arith.constant 0 : index
    %430 = vector.load %arg13[%c4_161, %c0_162, %c0_163] : memref<8x8x128xf32, #tpu.memory_space<vmem>>, vector<1x8x128xf32>
    %431 = vector.shape_cast %430 : vector<1x8x128xf32> to vector<8x128xf32>
    %432 = arith.mulf %352, %366 : vector<8x1xf32>
    %433 = vector.broadcast %432 : vector<8x1xf32> to vector<8x128xf32>
    %434 = arith.mulf %433, %431 : vector<8x128xf32>
    %cst_164 = arith.constant -3.000000e+00 : f32
    %435 = vector.broadcast %cst_164 : f32 to vector<8x1xf32>
    %436 = arith.mulf %368, %435 : vector<8x1xf32>
    %437 = math.exp %436 : vector<8x1xf32>
    %438 = arith.mulf %367, %437 : vector<8x1xf32>
    %439 = arith.addf %429, %434 : vector<8x128xf32>
    %440 = vector.broadcast %438 : vector<8x1xf32> to vector<8x128xf32>
    %441 = arith.mulf %440, %434 : vector<8x128xf32>
    %cst_165 = arith.constant 0.000000e+00 : f32
    %442 = vector.broadcast %cst_165 : f32 to vector<8x128xf32>
    %443 = arith.maximumf %441, %442 : vector<8x128xf32>
    %444 = arith.addf %439, %443 : vector<8x128xf32>
    %c5_166 = arith.constant 5 : index
    %c0_167 = arith.constant 0 : index
    %c0_168 = arith.constant 0 : index
    %445 = vector.load %arg13[%c5_166, %c0_167, %c0_168] : memref<8x8x128xf32, #tpu.memory_space<vmem>>, vector<1x8x128xf32>
    %446 = vector.shape_cast %445 : vector<1x8x128xf32> to vector<8x128xf32>
    %447 = arith.mulf %354, %366 : vector<8x1xf32>
    %448 = vector.broadcast %447 : vector<8x1xf32> to vector<8x128xf32>
    %449 = arith.mulf %448, %446 : vector<8x128xf32>
    %cst_169 = arith.constant -2.000000e+00 : f32
    %450 = vector.broadcast %cst_169 : f32 to vector<8x1xf32>
    %451 = arith.mulf %368, %450 : vector<8x1xf32>
    %452 = math.exp %451 : vector<8x1xf32>
    %453 = arith.mulf %367, %452 : vector<8x1xf32>
    %454 = arith.addf %444, %449 : vector<8x128xf32>
    %455 = vector.broadcast %453 : vector<8x1xf32> to vector<8x128xf32>
    %456 = arith.mulf %455, %449 : vector<8x128xf32>
    %cst_170 = arith.constant 0.000000e+00 : f32
    %457 = vector.broadcast %cst_170 : f32 to vector<8x128xf32>
    %458 = arith.maximumf %456, %457 : vector<8x128xf32>
    %459 = arith.addf %454, %458 : vector<8x128xf32>
    %c6_171 = arith.constant 6 : index
    %c0_172 = arith.constant 0 : index
    %c0_173 = arith.constant 0 : index
    %460 = vector.load %arg13[%c6_171, %c0_172, %c0_173] : memref<8x8x128xf32, #tpu.memory_space<vmem>>, vector<1x8x128xf32>
    %461 = vector.shape_cast %460 : vector<1x8x128xf32> to vector<8x128xf32>
    %462 = arith.mulf %356, %366 : vector<8x1xf32>
    %463 = vector.broadcast %462 : vector<8x1xf32> to vector<8x128xf32>
    %464 = arith.mulf %463, %461 : vector<8x128xf32>
    %cst_174 = arith.constant -1.000000e+00 : f32
    %465 = vector.broadcast %cst_174 : f32 to vector<8x1xf32>
    %466 = arith.mulf %368, %465 : vector<8x1xf32>
    %467 = math.exp %466 : vector<8x1xf32>
    %468 = arith.mulf %367, %467 : vector<8x1xf32>
    %469 = arith.addf %459, %464 : vector<8x128xf32>
    %470 = vector.broadcast %468 : vector<8x1xf32> to vector<8x128xf32>
    %471 = arith.mulf %470, %464 : vector<8x128xf32>
    %cst_175 = arith.constant 0.000000e+00 : f32
    %472 = vector.broadcast %cst_175 : f32 to vector<8x128xf32>
    %473 = arith.maximumf %471, %472 : vector<8x128xf32>
    %474 = arith.addf %469, %473 : vector<8x128xf32>
    %c7_176 = arith.constant 7 : index
    %c0_177 = arith.constant 0 : index
    %c0_178 = arith.constant 0 : index
    %475 = vector.load %arg13[%c7_176, %c0_177, %c0_178] : memref<8x8x128xf32, #tpu.memory_space<vmem>>, vector<1x8x128xf32>
    %476 = vector.shape_cast %475 : vector<1x8x128xf32> to vector<8x128xf32>
    %477 = arith.mulf %358, %366 : vector<8x1xf32>
    %478 = vector.broadcast %477 : vector<8x1xf32> to vector<8x128xf32>
    %479 = arith.mulf %478, %476 : vector<8x128xf32>
    %cst_179 = arith.constant -0.000000e+00 : f32
    %480 = vector.broadcast %cst_179 : f32 to vector<8x1xf32>
    %481 = arith.mulf %368, %480 : vector<8x1xf32>
    %482 = math.exp %481 : vector<8x1xf32>
    %483 = arith.mulf %367, %482 : vector<8x1xf32>
    %484 = arith.addf %474, %479 : vector<8x128xf32>
    %485 = vector.broadcast %483 : vector<8x1xf32> to vector<8x128xf32>
    %486 = arith.mulf %485, %479 : vector<8x128xf32>
    %cst_180 = arith.constant 0.000000e+00 : f32
    %487 = vector.broadcast %cst_180 : f32 to vector<8x128xf32>
    %488 = arith.maximumf %486, %487 : vector<8x128xf32>
    %489 = arith.addf %484, %488 : vector<8x128xf32>
    %490 = arith.truncf %489 : vector<8x128xf32> to vector<8x128xbf16>
    %c0_181 = arith.constant 0 : index
    %c0_182 = arith.constant 0 : index
    %491 = vector.load %arg7[%c0_181, %c0_182] : memref<128x128xbf16, #tpu.memory_space<vmem>>, vector<128x128xbf16>
    %cst_183 = arith.constant dense<0.000000e+00> : vector<8x128xf32>
    %492 = tpu.matmul %490, %491, %cst_183 {dimension_numbers = #tpu.dot_dimension_numbers<[1], [0], [0], [1], [0, 0, 1, 1], [], []>} : vector<8x128xbf16>, vector<128x128xbf16>, vector<8x128xf32> -> vector<8x128xf32>
    %493 = arith.truncf %295 : vector<8x128xf32> to vector<8x128xbf16>
    %c0_184 = arith.constant 0 : index
    %c0_185 = arith.constant 0 : index
    %494 = vector.load %arg8[%c0_184, %c0_185] : memref<128x128xbf16, #tpu.memory_space<vmem>>, vector<128x128xbf16>
    %cst_186 = arith.constant dense<0.000000e+00> : vector<8x128xf32>
    %495 = tpu.matmul %493, %494, %cst_186 {dimension_numbers = #tpu.dot_dimension_numbers<[1], [0], [0], [1], [0, 0, 1, 1], [], []>} : vector<8x128xbf16>, vector<128x128xbf16>, vector<8x128xf32> -> vector<8x128xf32>
    %496 = arith.addf %492, %495 : vector<8x128xf32>
    %497 = math.tanh %496 : vector<8x128xf32>
    %c0_187 = arith.constant 0 : index
    %c0_188 = arith.constant 0 : index
    %498 = vector.load %arg11[%c0_187, %c0_188] : memref<8x128xf32, #tpu.memory_space<vmem>>, vector<8x128xf32>
    tpu.vector_store %arg11[%c0_187, %c0_188], %497 {strides = array<i32>} : memref<8x128xf32, #tpu.memory_space<vmem>>, vector<8x128xf32>,
    return
  }
  func.func @transform_0(%arg0: i32) -> (i32, i32, i32) {
    %c0_i32 = arith.constant 0 : i32
    %c0_i32_0 = arith.constant 0 : i32
    %c0_i32_1 = arith.constant 0 : i32
    return %c0_i32, %arg0, %c0_i32_0 : i32, i32, i32
  }
  func.func @transform_1(%arg0: i32) -> (i32, i32) {
    %c0_i32 = arith.constant 0 : i32
    %c0_i32_0 = arith.constant 0 : i32
    %c0_i32_1 = arith.constant 0 : i32
    return %c0_i32, %c0_i32_0 : i32, i32
  }
  func.func @transform_2(%arg0: i32) -> (i32, i32) {
    %c0_i32 = arith.constant 0 : i32
    %c0_i32_0 = arith.constant 0 : i32
    %c0_i32_1 = arith.constant 0 : i32
    return %c0_i32, %c0_i32_0 : i32, i32
  }
  func.func @transform_3(%arg0: i32) -> (i32, i32) {
    %c0_i32 = arith.constant 0 : i32
    %c0_i32_0 = arith.constant 0 : i32
    %c0_i32_1 = arith.constant 0 : i32
    return %c0_i32, %c0_i32_0 : i32, i32
  }
  func.func @transform_4(%arg0: i32) -> (i32, i32) {
    %c0_i32 = arith.constant 0 : i32
    %c0_i32_0 = arith.constant 0 : i32
    %c0_i32_1 = arith.constant 0 : i32
    return %c0_i32, %c0_i32_0 : i32, i32
  }
  func.func @transform_5(%arg0: i32) -> (i32, i32) {
    %c0_i32 = arith.constant 0 : i32
    %c0_i32_0 = arith.constant 0 : i32
    %c0_i32_1 = arith.constant 0 : i32
    return %c0_i32, %c0_i32_0 : i32, i32
  }
  func.func @transform_6(%arg0: i32) -> (i32, i32) {
    %c0_i32 = arith.constant 0 : i32
    %c0_i32_0 = arith.constant 0 : i32
    %c0_i32_1 = arith.constant 0 : i32
    return %c0_i32, %c0_i32_0 : i32, i32
  }
  func.func @transform_7(%arg0: i32) -> (i32, i32) {
    %c0_i32 = arith.constant 0 : i32
    %c0_i32_0 = arith.constant 0 : i32
    %c0_i32_1 = arith.constant 0 : i32
    return %c0_i32, %c0_i32_0 : i32, i32
  }
  func.func @transform_8(%arg0: i32) -> (i32, i32) {
    %c0_i32 = arith.constant 0 : i32
    %c0_i32_0 = arith.constant 0 : i32
    return %arg0, %c0_i32 : i32, i32
  }
  func.func @transform_9(%arg0: i32) -> (i32, i32) {
    %c0_i32 = arith.constant 0 : i32
    %c0_i32_0 = arith.constant 0 : i32
    return %arg0, %c0_i32 : i32, i32
  }
  func.func @transform_10(%arg0: i32) -> (i32, i32) {
    %c0_i32 = arith.constant 0 : i32
    %c0_i32_0 = arith.constant 0 : i32
    return %arg0, %c0_i32 : i32, i32
  }
}

</mosaic_0001>

<bundles_post_ra>
// kernel: tpu_custom_call.1
= control target key start
LH: loop header
LB: loop body
LE: loop exit
PB: predicated region body
PF: predicated region fallthrough
CT: control target
= control target key end

     0   :  { %15 = vsyncpa [#allocation5], 0  ;;  %s4727_s0 = inlined_call_operand.hbm [shape: bf16[8,8,16], index: 0, kind: input, shape index: {}]   ;;  %s4728_s1 = inlined_call_operand.hbm [shape: bf16[16,384], index: 1, kind: input, shape index: {}]   ;;  %s4729_s2 = inlined_call_operand.hbm [shape: bf16[128,384], index: 2, kind: input, shape index: {}]   ;;  %s4730_s3 = inlined_call_operand.vmem [shape: f32[1,384], index: 3, kind: input, shape index: {}]   ;;  %s4731_s4 = inlined_call_operand.vmem [shape: f32[1,128], index: 4, kind: input, shape index: {}]   ;;  %s4732_s5 = inlined_call_operand.hbm [shape: bf16[128,128], index: 5, kind: input, shape index: {}]   ;;  %s4733_s6 = inlined_call_operand.hbm [shape: bf16[128,128], index: 6, kind: input, shape index: {}]   ;;  %s4734_s7 = inlined_call_operand.hbm [shape: bf16[128,128], index: 7, kind: input, shape index: {}]   ;;  %s4735_s8 = inlined_call_operand.vmem [shape: f32[8,1], index: 8, kind: input, shape index: {}]   ;;  %s4736_s9 = inlined_call_operand.vmem [shape: f32[8,1], index: 9, kind: input, shape index: {}]   ;;  %s4737_s10 = inlined_call_operand.hbm [shape: f32[8,128], index: 10, kind: output, shape index: {}]  }
   0x1   :  { %16 = vsyncpa [#allocation8], 0 }
   0x2   :  { %17 = vsyncpa [#allocation11], 0 }
   0x3   :  { %18 = vsyncpa [#allocation14], 0 }
   0x4   :  { %19 = vsyncpa [#allocation6], 0  ;;  %s4078_s13 = smov [#allocation7]   ;;  %s3914_s17 = scalar_lea.hbm %s4728_s1, 384 }
   0x5   :  { %s37_s14 = sshll.u32 %s4078_s13, 4  ;;  %p3915_p0 = scmp.ne.s32.totalorder %s4728_s1, %s3914_s17  ;;  %s38_s14 = int_to_ptr.vmem [resolvable:$true] %s37_s14 }
   0x6   :  { %p3918_p1 = scmp.lt.u32.totalorder %s3914_s17, %s4728_s1 }
   0x8   :  { %p3920_p2 = pnand %p3918_p1, %p3915_p0 }
   0xa   :  { %3923 = shalt.err (!%p3920_p2)
}
   0xb   :  { %s3924_s22 = scalar_lea.vmem %s38_s14, 384  ;;  %p3929_p4 = scmp.lt.s32.totalorder %s38_s14, %s38_s14 }
   0xc   :  { %p3925_p3 = scmp.ne.s32.totalorder %s38_s14, %s3924_s22  ;;  %p3930_p5 = scmp.lt.s32.totalorder %s3924_s22, %s3924_s22 }
   0xe   :  { %p3931_p6 = por %p3930_p5, %p3929_p4 }
  0x10   :  { %p3932_p7 = pnand %p3931_p6, %p3925_p3 }
  0x12   :  { %3935 = shalt.err (!%p3932_p7)
}
  0x13   :  { %s4079_s23 = smov 192   ;;  %s4080_s24 = smov 12  }
  0x14   :  { %43 = dma.hbm_to_vmem [thread:$0]  %s4728_s1, 384, %s38_s14, [#allocation8], %s4079_s23, %s4079_s23, %s4080_s24  }
  0x15   :  { %s4081_s27 = smov [#allocation10]   ;;  %s4082_s29 = smov [#allocation4]  }
  0x16   :  { %s65_s28 = sshll.u32 %s4081_s27, 4  ;;  %s25_s30 = sshll.u32 %s4082_s29, 4  ;;  %s66_s28 = int_to_ptr.vmem [resolvable:$true] %s65_s28  ;;  %s26_s30 = int_to_ptr.vmem [resolvable:$true] %s25_s30 }
  0x17   :  { %s3936_s13 = scalar_lea.hbm %s4732_s5, 1024 }
  0x18   :  { %p3937_p8 = scmp.ne.s32.totalorder %s4732_s5, %s3936_s13  ;;  %p3940_p9 = scmp.lt.u32.totalorder %s3936_s13, %s4732_s5 }
  0x1a   :  { %p3942_p10 = pnand %p3940_p9, %p3937_p8 }
  0x1c   :  { %3945 = shalt.err (!%p3942_p10)
}
  0x1d   :  { %s3946_s1 = scalar_lea.vmem %s66_s28, 1024  ;;  %p3951_p12 = scmp.lt.s32.totalorder %s66_s28, %s66_s28 }
  0x1e   :  { %p3947_p11 = scmp.ne.s32.totalorder %s66_s28, %s3946_s1  ;;  %p3952_p13 = scmp.lt.s32.totalorder %s3946_s1, %s3946_s1 }
  0x20   :  { %p3953_p0 = por %p3952_p13, %p3951_p12 }
  0x22   :  { %p3954_p1 = pnand %p3953_p0, %p3947_p11 }
  0x24   :  { %3957 = shalt.err (!%p3954_p1)
}
  0x25   :  { %s4083_s14 = smov 64   ;;  %s4084_s19 = smov 4  }
  0x26   :  { %71 = dma.hbm_to_vmem [thread:$0]  %s4732_s5, 1024, %s66_s28, [#allocation11], %s4083_s14, %s4083_s14, %s4084_s19  }
  0x27   :  { %s3958_s26 = scalar_lea.hbm %s4727_s0, 512 }
  0x28   :  { %p3959_p2 = scmp.ne.s32.totalorder %s4727_s0, %s3958_s26  ;;  %p3962_p3 = scmp.lt.u32.totalorder %s3958_s26, %s4727_s0 }
  0x2a   :  { %p3964_p4 = pnand %p3962_p3, %p3959_p2 }
  0x2c   :  { %3967 = shalt.err (!%p3964_p4)
}
  0x2d   :  { %s3968_s13 = scalar_lea.vmem %s26_s30, 512  ;;  %p3973_p6 = scmp.lt.s32.totalorder %s26_s30, %s26_s30 }
  0x2e   :  { %p3969_p5 = scmp.ne.s32.totalorder %s26_s30, %s3968_s13  ;;  %p3974_p7 = scmp.lt.s32.totalorder %s3968_s13, %s3968_s13 }
  0x30   :  { %p3975_p8 = por %p3974_p7, %p3973_p6 }
  0x32   :  { %p3976_p9 = pnand %p3975_p8, %p3969_p5 }
  0x34   :  { %3979 = shalt.err (!%p3976_p9)
}
  0x35   :  { %31 = dma.hbm_to_vmem [thread:$0]  %s4727_s0, 512, %s26_s30, [#allocation5], %s4083_s14, %s4083_s14, %s4084_s19  }
  0x36   :  { %s4085_s15 = smov [#allocation9]   ;;  %s4086_s17 = smov [#allocation12]  }
  0x37   :  { %s49_s16 = sshll.u32 %s4085_s15, 4  ;;  %s77_s18 = sshll.u32 %s4086_s17, 4  ;;  %s50_s16 = int_to_ptr.vmem [resolvable:$true] %s49_s16  ;;  %s78_s18 = int_to_ptr.vmem [resolvable:$true] %s77_s18 }
  0x38   :  { %s3980_s21 = scalar_lea.hbm %s4729_s2, 3072 }
  0x39   :  { %p3981_p10 = scmp.ne.s32.totalorder %s4729_s2, %s3980_s21  ;;  %p3984_p11 = scmp.lt.u32.totalorder %s3980_s21, %s4729_s2 }
  0x3b   :  { %p3986_p12 = pnand %p3984_p11, %p3981_p10 }
  0x3d   :  { %3989 = shalt.err (!%p3986_p12)
}
  0x3e   :  { %s3990_s0 = scalar_lea.vmem %s50_s16, 3072  ;;  %p3995_p0 = scmp.lt.s32.totalorder %s50_s16, %s50_s16 }
  0x3f   :  { %p3991_p13 = scmp.ne.s32.totalorder %s50_s16, %s3990_s0  ;;  %p3996_p1 = scmp.lt.s32.totalorder %s3990_s0, %s3990_s0 }
  0x41   :  { %p3997_p2 = por %p3996_p1, %p3995_p0 }
  0x43   :  { %p3998_p3 = pnand %p3997_p2, %p3991_p13 }
  0x45   :  { %4001 = shalt.err (!%p3998_p3)
}
  0x46   :  { %55 = dma.hbm_to_vmem [thread:$0]  %s4729_s2, 3072, %s50_s16, [#allocation8], %s4079_s23, %s4079_s23, %s4080_s24  }
  0x47   :  { %s4002_s13 = scalar_lea.hbm %s4733_s6, 1024 }
  0x48   :  { %p4003_p4 = scmp.ne.s32.totalorder %s4733_s6, %s4002_s13  ;;  %p4006_p5 = scmp.lt.u32.totalorder %s4002_s13, %s4733_s6 }
  0x4a   :  { %p4008_p6 = pnand %p4006_p5, %p4003_p4 }
  0x4c   :  { %4011 = shalt.err (!%p4008_p6)
}
  0x4d   :  { %s4012_s1 = scalar_lea.vmem %s78_s18, 1024  ;;  %p4017_p8 = scmp.lt.s32.totalorder %s78_s18, %s78_s18 }
  0x4e   :  { %p4013_p7 = scmp.ne.s32.totalorder %s78_s18, %s4012_s1  ;;  %p4018_p9 = scmp.lt.s32.totalorder %s4012_s1, %s4012_s1 }
  0x50   :  { %p4019_p10 = por %p4018_p9, %p4017_p8 }
  0x52   :  { %p4020_p11 = pnand %p4019_p10, %p4013_p7 }
  0x54   :  { %4023 = shalt.err (!%p4020_p11)
}
  0x55   :  { %83 = dma.hbm_to_vmem [thread:$0]  %s4733_s6, 1024, %s78_s18, [#allocation11], %s4083_s14, %s4083_s14, %s4084_s19  }
  0x56   :  { %s4087_s24 = smov [#allocation13]   ;;  %s4024_s22 = scalar_lea.hbm %s4734_s7, 1024 }
  0x57   :  { %s89_s16 = sshll.u32 %s4087_s24, 4  ;;  %p4025_p12 = scmp.ne.s32.totalorder %s4734_s7, %s4024_s22  ;;  %s90_s16 = int_to_ptr.vmem [resolvable:$true] %s89_s16 }
  0x58   :  { %p4028_p13 = scmp.lt.u32.totalorder %s4024_s22, %s4734_s7 }
  0x5a   :  { %p4030_p0 = pnand %p4028_p13, %p4025_p12 }
  0x5c   :  { %4033 = shalt.err (!%p4030_p0)
}
  0x5d   :  { %s4034_s30 = scalar_lea.vmem %s90_s16, 1024  ;;  %p4039_p2 = scmp.lt.s32.totalorder %s90_s16, %s90_s16 }
  0x5e   :  { %p4035_p1 = scmp.ne.s32.totalorder %s90_s16, %s4034_s30  ;;  %p4040_p3 = scmp.lt.s32.totalorder %s4034_s30, %s4034_s30 }
  0x60   :  { %p4041_p4 = por %p4040_p3, %p4039_p2 }
  0x62   :  { %p4042_p5 = pnand %p4041_p4, %p4035_p1 }
  0x64   :  { %4045 = shalt.err (!%p4042_p5)
}
  0x65   :  { %95 = dma.hbm_to_vmem [thread:$0]  %s4734_s7, 1024, %s90_s16, [#allocation14], %s4083_s14, %s4083_s14, %s4084_s19  }
  0x66   :  { %4068 = dma.done.wait [#allocation5], 512  }
  0x67   :  { %4069 = vsyncadd [#allocation5], 4294966784 }
  0x68   :  { %4070 = dma.done.wait [#allocation8], 3456  }
  0x69   :  { %4071 = vsyncadd [#allocation8], 4294963840 }
  0x6a   :  { %4072 = dma.done.wait [#allocation11], 2048  }
  0x6b   :  { %4073 = vsyncadd [#allocation11], 4294965248 }
  0x6c   :  { %4074 = dma.done.wait [#allocation14], 1024  }
  0x6d   :  { %4075 = vsyncadd [#allocation14], 4294966272  ;;  %v4088_v0 = vmov 0   ;;  %v3653_v1 = vld [vmem:[#allocation7 + $0x4] ss:$12 sps:$4 sm:$0xff]   ;;  %vm184_vm0 = vcmask 130048   ;;  %v133_v41 = vlaneseq }
  0x6e   :  { %229 = vmatprep.mubr.bf16.mxu0 %v4088_v0  ;;  %3652 = vset.pattern.permute.xlu1 %v4088_v0  ;;  %v3655_v2 = vld [vmem:[#allocation7] ss:$12 sps:$4 sm:$0xff]   ;;  %v4240_v4 = vld [vmem:[#allocation9] ss:$12 sps:$4 sm:$0xff]   ;;  %v4242_v5 = vld [vmem:[#allocation9 + $0x4] ss:$12 sps:$4 sm:$0xff]  }
  0x6f   :  { %3651 = vset.pattern.permute.xlu0 %v4088_v0  ;;  %197 = vmatprep.subr.bf16.mxu0 %v3653_v1  ;;  %v3656_v3 = vld [vmem:[#allocation4] sm:$0xff]   ;;  %v4250_v7 = vld [vmem:[#allocation9 + $0x18] ss:$12 sps:$4 sm:$0xff]   ;;  %v4254_v8 = vld [vmem:[#allocation9 + $0x34] ss:$12 sps:$4 sm:$0xff]   ;;  %v4089_v16 = vmov 0.0  }
  0x70   :  { %198 = vmatpush1.bf16.msra.mxu0 %v3655_v2  ;;  %v4244_v6 = vld [vmem:[#allocation9 + $0x1c] ss:$12 sps:$4 sm:$0xff]   ;;  %3405 = vmatprep.mubr.msk.bf16.mxu1 %vm184_vm0, %v3656_v3  ;;  %v3663_v9 = vld [vmem:[#allocation4 + $0x8] sm:$0xff]   ;;  %v4260_v12 = vld [vmem:[#allocation9 + $0x4c] ss:$12 sps:$4 sm:$0xff]   ;;  %vm4090_vm1 = vmmov 0  }
  0x71   :  { %529 = vmatprep.subr.bf16.mxu0 %v4242_v5  ;;  %v4256_v10 = vld [vmem:[#allocation9 + $0x30] ss:$12 sps:$4 sm:$0xff]   ;;  %v4263_v13 = vld [vmem:[#allocation9 + $0x48] ss:$12 sps:$4 sm:$0xff]   ;;  %v3686_v18 = vld [vmem:[#allocation9 + $0x20] ss:$12 sps:$4 sm:$0xff]  }
  0x72   :  { %v3674_v11 = vld [vmem:[#allocation7 + $0x8] ss:$12 sps:$4 sm:$0xff]   ;;  %v3682_v17 = vld [vmem:[#allocation9 + $0x8] ss:$12 sps:$4 sm:$0xff]   ;;  %v4274_v19 = vld [vmem:[#allocation9 + $0x60] ss:$12 sps:$4 sm:$0xff]  }
  0x73   :  { %3058 = vmatmul.mubr.msk.bf16.vlgmr.msra.gmra.mrb[0].mxu0 %vm184_vm0, %v3656_v3  ;;  %3403 = vmatprep.subr.bf16.mxu1 %v3674_v11  ;;  %v3670_v14 = vld [vmem:[#allocation4 + $0x10] sm:$0xff]   ;;  %v4267_v15 = vld [vmem:[#allocation9 + $0x64] ss:$12 sps:$4 sm:$0xff]   ;;  %v4286_v24 = vld [vmem:[#allocation9 + $0x94] ss:$12 sps:$4 sm:$0xff]   ;;  %v134_v42 = vshrl.u32 %v133_v41, 7 }
  0x74   :  { %530 = vmatpush1.bf16.msra.mxu0 %v4240_v4  ;;  %239 = vmatprep.mubr.bf16.mxu0 %v4088_v0  ;;  %v4278_v20 = vld [vmem:[#allocation9 + $0x7c] ss:$12 sps:$4 sm:$0xff]   ;;  %v4280_v21 = vld [vmem:[#allocation9 + $0x78] ss:$12 sps:$4 sm:$0xff]   ;;  %v3690_v30 = vld [vmem:[#allocation9 + $0x80] ss:$12 sps:$4 sm:$0xff]  }
  0x75   :  { %531 = vmatprep.subr.bf16.mxu0 %v4244_v6  ;;  %3404 = vmatpush3.bf16.msra.mxu1 %v3674_v11  ;;  %v3687_v22 = vld [vmem:[#allocation9 + $0x38] ss:$12 sps:$4 sm:$0xff]   ;;  %v4289_v25 = vld [vmem:[#allocation9 + $0x90] ss:$12 sps:$4 sm:$0xff]   ;;  %v3689_v28 = vld [vmem:[#allocation9 + $0x68] ss:$12 sps:$4 sm:$0xff]  }
  0x76   :  { %3413 = vmatprep.subr.bf16.mxu1 %v4089_v16  ;;  %v3678_v23 = vld [vmem:[#allocation4 + $0x18] sm:$0xff]   ;;  %v3688_v26 = vld [vmem:[#allocation9 + $0x50] ss:$12 sps:$4 sm:$0xff]   ;;  %v4292_v27 = vld [vmem:[#allocation9 + $0xac] ss:$12 sps:$4 sm:$0xff]   ;;  %v135_v43 = vsub.s32 0, %v134_v42 }
  0x77   :  { %v4299_v29 = vld [vmem:[#allocation9 + $0xa8] ss:$12 sps:$4 sm:$0xff]   ;;  %v3691_v31 = vld [vmem:[#allocation9 + $0x98] ss:$12 sps:$4 sm:$0xff]   ;;  %v3692_v32 = vld [vmem:[#allocation9 + $0xb0] ss:$12 sps:$4 sm:$0xff]  }
  0x78   :  { %532 = vmatpush1.bf16.msra.mxu0 %v4250_v7  ;;  %3406 = vmatmul.mubr.msk.bf16.vlgmr.msra.gmra.mrb[0].mxu1 %vm184_vm0, %v3663_v9  ;;  %v3693_v33 = vld [vmem:[#allocation9 + $0x8] ss:$12 sps:$4 sm:$0xff]   ;;  %v3694_v34 = vld [vmem:[#allocation9 + $0x20] ss:$12 sps:$4 sm:$0xff]   ;;  %v3695_v35 = vld [vmem:[#allocation9 + $0x38] ss:$12 sps:$4 sm:$0xff]  }
  0x79   :  { %533 = vmatprep.subr.bf16.mxu0 %v4254_v8  ;;  %3414 = vmatpush3.bf16.msra.mxu1 %v3682_v17  ;;  %v3696_v36 = vld [vmem:[#allocation9 + $0x50] ss:$12 sps:$4 sm:$0xff]   ;;  %v3697_v37 = vld [vmem:[#allocation9 + $0x68] ss:$12 sps:$4 sm:$0xff]   ;;  %v3698_v38 = vld [vmem:[#allocation9 + $0x80] ss:$12 sps:$4 sm:$0xff]  }
  0x7a   :  { %3409 = vmatprep.mubr.msk.bf16.mxu1 %vm184_vm0, %v3670_v14  ;;  %3415 = vmatprep.subr.bf16.mxu1 %v4089_v16  ;;  %v3699_v39 = vld [vmem:[#allocation9 + $0x98] ss:$12 sps:$4 sm:$0xff]   ;;  %v3700_v40 = vld [vmem:[#allocation9 + $0xb0] ss:$12 sps:$4 sm:$0xff]   ;;  %v131_v44 = vld [vmem:[%s4730_s3] sm:$0x7] }
  0x7b   :  { %3059 = vmatmul.mubr.msk.bf16.gmra.mrb[4].mxu0 %vm184_vm0, %v3663_v9  ;;  %v139_v45 = vsub.s32 1, %v134_v42  ;;  %v136_v47 = vrot.slane %v131_v44, %v135_v43  ;;  %v143_v54 = vsub.s32 2, %v134_v42 }
  0x7c   :  { %534 = vmatpush1.bf16.msra.mxu0 %v4256_v10  ;;  %249 = vmatprep.mubr.bf16.mxu0 %v4088_v0 }
  0x7d   :  { %535 = vmatprep.subr.bf16.mxu0 %v4260_v12  ;;  %3416 = vmatpush3.bf16.msra.mxu1 %v3686_v18  ;;  %v140_v49 = vrot.slane %v131_v44, %v139_v45  ;;  %v4348_v56 = vrot.slane %v131_v44, %v143_v54 }
  0x7e   :  { %3417 = vmatprep.subr.bf16.mxu1 %v4089_v16 }
  0x80   :  { %536 = vmatpush1.bf16.msra.mxu0 %v4263_v13  ;;  %3410 = vmatmul.mubr.msk.bf16.gmra.mrb[4].mxu1 %vm184_vm0, %v3678_v23 }
  0x81   :  { %537 = vmatprep.subr.bf16.mxu0 %v4267_v15  ;;  %3418 = vmatpush3.bf16.msra.mxu1 %v3687_v22 }
  0x82   :  { %3429 = vmatprep.mubr.msk.bf16.mxu1 %vm4090_vm1, %v4089_v16  ;;  %3419 = vmatprep.subr.bf16.mxu1 %v4089_v16 }
  0x83   :  { %3060 = vmatmul.mubr.msk.bf16.gmra.mrb[8].mxu0 %vm184_vm0, %v3670_v14 }
  0x84   :  { %538 = vmatpush1.bf16.msra.mxu0 %v4274_v19  ;;  %259 = vmatprep.mubr.bf16.mxu0 %v4088_v0 }
  0x85   :  { %539 = vmatprep.subr.bf16.mxu0 %v4278_v20  ;;  %3420 = vmatpush3.bf16.msra.mxu1 %v3688_v26 }
  0x86   :  { %3421 = vmatprep.subr.bf16.mxu1 %v4089_v16 }
  0x88   :  { %540 = vmatpush1.bf16.msra.mxu0 %v4280_v21 }
  0x89   :  { %541 = vmatprep.subr.bf16.mxu0 %v4286_v24  ;;  %3422 = vmatpush3.bf16.msra.mxu1 %v3689_v28 }
  0x8a   :  { %3423 = vmatprep.subr.bf16.mxu1 %v4089_v16 }
  0x8b   :  { %3061 = vmatmul.mubr.msk.bf16.gmra.mrb[12].mxu0 %vm184_vm0, %v3678_v23 }
  0x8c   :  { %542 = vmatpush1.bf16.msra.mxu0 %v4289_v25  ;;  %561 = vmatprep.mubr.bf16.mxu0 %v4088_v0 }
  0x8d   :  { %543 = vmatprep.subr.bf16.mxu0 %v4292_v27  ;;  %3424 = vmatpush3.bf16.msra.mxu1 %v3690_v30 }
  0x8e   :  { %3425 = vmatprep.subr.bf16.mxu1 %v4089_v16 }
  0x90   :  { %544 = vmatpush1.bf16.msra.mxu0 %v4299_v29 }
  0x91   :  { %798 = vmatprep.subr.bf16.mxu0 %v4242_v5  ;;  %3426 = vmatpush3.bf16.msra.mxu1 %v3691_v31 }
  0x92   :  { %3427 = vmatprep.subr.bf16.mxu1 %v4089_v16 }
  0x93   :  { %562 = vmatmul.mubr.bf16.vlgmr.msra.gmra.mrb[16].mxu0 %v4088_v0 }
  0x94   :  { %799 = vmatpush1.bf16.msra.mxu0 %v4240_v4  ;;  %830 = vmatprep.mubr.bf16.mxu0 %v4088_v0 }
  0x95   :  { %800 = vmatprep.subr.bf16.mxu0 %v4244_v6  ;;  %3428 = vmatpush3.bf16.msra.mxu1 %v3692_v32 }
  0x96   :  { %3433 = vmatprep.subr.bf16.mxu1 %v4089_v16 }
  0x98   :  { %801 = vmatpush1.bf16.msra.mxu0 %v4250_v7  ;;  %3430 = vmatmul.mubr.bf16.vlgmr.msra.gmra.mrb[8].mxu1 %v4088_v0 }
  0x99   :  { %802 = vmatprep.subr.bf16.mxu0 %v4254_v8  ;;  %3449 = vmatprep.mubr.msk.bf16.mxu1 %vm4090_vm1, %v4089_v16 }
  0x9a   :  { %3434 = vmatpush3.bf16.msra.mxu1 %v3693_v33 }
  0x9b   :  { %3435 = vmatprep.subr.bf16.mxu1 %v4089_v16 }
  0x9c   :  { %803 = vmatpush1.bf16.msra.mxu0 %v4256_v10 }
  0x9d   :  { %804 = vmatprep.subr.bf16.mxu0 %v4260_v12 }
  0x9e   :  { %3436 = vmatpush3.bf16.msra.mxu1 %v3694_v34 }
  0x9f   :  { %3437 = vmatprep.subr.bf16.mxu1 %v4089_v16 }
  0xa0   :  { %805 = vmatpush1.bf16.msra.mxu0 %v4263_v13 }
  0xa1   :  { %806 = vmatprep.subr.bf16.mxu0 %v4267_v15 }
  0xa2   :  { %3438 = vmatpush3.bf16.msra.mxu1 %v3695_v35 }
  0xa3   :  { %3439 = vmatprep.subr.bf16.mxu1 %v4089_v16 }
  0xa4   :  { %807 = vmatpush1.bf16.msra.mxu0 %v4274_v19 }
  0xa5   :  { %808 = vmatprep.subr.bf16.mxu0 %v4278_v20 }
  0xa6   :  { %3440 = vmatpush3.bf16.msra.mxu1 %v3696_v36 }
  0xa7   :  { %3441 = vmatprep.subr.bf16.mxu1 %v4089_v16 }
  0xa8   :  { %809 = vmatpush1.bf16.msra.mxu0 %v4280_v21 }
  0xa9   :  { %810 = vmatprep.subr.bf16.mxu0 %v4286_v24 }
  0xaa   :  { %3442 = vmatpush3.bf16.msra.mxu1 %v3697_v37 }
  0xab   :  { %3443 = vmatprep.subr.bf16.mxu1 %v4089_v16 }
  0xac   :  { %811 = vmatpush1.bf16.msra.mxu0 %v4289_v25 }
  0xad   :  { %812 = vmatprep.subr.bf16.mxu0 %v4292_v27 }
  0xae   :  { %3444 = vmatpush3.bf16.msra.mxu1 %v3698_v38 }
  0xaf   :  { %3445 = vmatprep.subr.bf16.mxu1 %v4089_v16 }
  0xb0   :  { %813 = vmatpush1.bf16.msra.mxu0 %v4299_v29 }
  0xb1   :  { %1068 = vmatprep.subr.bf16.mxu0 %v4242_v5 }
  0xb2   :  { %3446 = vmatpush3.bf16.msra.mxu1 %v3699_v39 }
  0xb3   :  { %3447 = vmatprep.subr.bf16.mxu1 %v4089_v16 }
  0xb6   :  { %3448 = vmatpush3.bf16.msra.mxu1 %v3700_v40 }
  0xb7   :  { %3453 = vmatprep.subr.bf16.mxu1 %v4089_v16 }
 0x146   :  { %v231_v46 = vpop.f32.mrb[0].mxu0 }
 0x147   :  { %v233_v48 = vpop.f32.mrb[1].mxu0 }
 0x148   :  { %v235_v50 = vpop.f32.mrb[2].mxu0 }
 0x149   :  { %v4344_v51 = vadd.f32 %v235_v50, %v136_v47  ;;  %v237_v52 = vpop.f32.mrb[3].mxu0 }
 0x14a   :  { %v4346_v53 = vadd.f32 %v237_v52, %v140_v49 }
 0x14b   :  { %v3407_v63 = vpop.f32.mrb[0].mxu1 }
 0x14c   :  { %v4359_v2 = vadd.f32 %v3407_v63, %v4348_v56  ;;  %v304_v3 = vpop.f32.mrb[1].mxu1 }
 0x14d   :  { %v3408_v9 = vpop.f32.mrb[2].mxu1 }
 0x14e   :  { %v241_v55 = vpop.f32.mrb[4].mxu0  ;;  %v4362_v11 = vadd.f32 %v3408_v9, %v4348_v56  ;;  %v307_v14 = vpop.f32.mrb[3].mxu1 }
 0x14f   :  { %v4350_v57 = vadd.f32 %v241_v55, %v136_v47  ;;  %v243_v58 = vpop.f32.mrb[5].mxu0  ;;  %v4365_v17 = vadd.f32 %v307_v14, %v4348_v56  ;;  %v232_v55 = vadd.f32 %v231_v46, %v136_v47  ;;  %v4398_v46 = vld [vmem:[%s4731_s4] ss:$0 sm:$0xff] }
 0x150   :  { %v4352_v59 = vadd.f32 %v243_v58, %v140_v49  ;;  %v245_v60 = vpop.f32.mrb[6].mxu0  ;;  %v234_v58 = vadd.f32 %v233_v48, %v140_v49 }
 0x151   :  { %v4354_v61 = vadd.f32 %v245_v60, %v136_v47  ;;  %v247_v62 = vpop.f32.mrb[7].mxu0 }
 0x152   :  { %v4356_v1 = vadd.f32 %v247_v62, %v140_v49 }
 0x153   :  { %v3411_v32 = vpop.f32.mrb[4].mxu1 }
 0x154   :  { %v4376_v34 = vadd.f32 %v3411_v32, %v4348_v56  ;;  %v320_v35 = vpop.f32.mrb[5].mxu1 }
 0x155   :  { %v4379_v36 = vadd.f32 %v320_v35, %v4348_v56  ;;  %v3412_v37 = vpop.f32.mrb[6].mxu1 }
 0x156   :  { %v251_v18 = vpop.f32.mrb[8].mxu0  ;;  %v4382_v38 = vadd.f32 %v3412_v37, %v4348_v56  ;;  %v323_v39 = vpop.f32.mrb[7].mxu1 }
 0x157   :  { %v4367_v22 = vadd.f32 %v251_v18, %v136_v47  ;;  %v253_v23 = vpop.f32.mrb[9].mxu0  ;;  %v4385_v40 = vadd.f32 %v323_v39, %v4348_v56 }
 0x158   :  { %v4369_v26 = vadd.f32 %v253_v23, %v140_v49  ;;  %v255_v28 = vpop.f32.mrb[10].mxu0 }
 0x159   :  { %v4371_v30 = vadd.f32 %v255_v28, %v136_v47  ;;  %v257_v31 = vpop.f32.mrb[11].mxu0 }
 0x15a   :  { %v4373_v33 = vadd.f32 %v257_v31, %v140_v49 }
 0x15e   :  { %v261_v41 = vpop.f32.mrb[12].mxu0 }
 0x15f   :  { %v4387_v42 = vadd.f32 %v261_v41, %v136_v47  ;;  %v263_v43 = vpop.f32.mrb[13].mxu0 }
 0x160   :  { %v4389_v44 = vadd.f32 %v263_v43, %v140_v49  ;;  %v265_v45 = vpop.f32.mrb[14].mxu0 }
 0x161   :  { %v4391_v50 = vadd.f32 %v265_v45, %v136_v47  ;;  %v267_v52 = vpop.f32.mrb[15].mxu0  ;;  %v305_v45 = vadd.f32 %v304_v3, %v4348_v56  ;;  %v3701_v56 = vld [vmem:[#allocation9 + $0x8] ss:$12 sps:$4 sm:$0xff]   ;;  %v3702_v3 = vld [vmem:[#allocation9 + $0x20] ss:$12 sps:$4 sm:$0xff]  }
 0x162   :  { %v4393_v54 = vadd.f32 %v267_v52, %v140_v49 }
 0x166   :  { %v563_v60 = vpop.f32.mrb[16].mxu0 }
 0x167   :  { %v610_v62 = vadd.f32 %v563_v60, %v232_v55  ;;  %v565_v63 = vpop.f32.mrb[17].mxu0 }
 0x168   :  { %v617_v9 = vadd.f32 %v565_v63, %v234_v58  ;;  %v567_v14 = vpop.f32.mrb[18].mxu0 }
 0x169   :  { %v3091_v18 = vmul.f32 -1.442695, %v610_v62  ;;  %v568_v23 = vpop.f32.mrb[19].mxu0 }
 0x16a   :  { %v3092_v28 = vmul.f32 -1.442695, %v617_v9  ;;  %v3703_v23 = vld [vmem:[#allocation9 + $0x38] ss:$12 sps:$4 sm:$0xff]  }
 0x16b   :  { %3797 = vpow2.f32 %v3091_v18  ;;  %v604_v31 = vpop.f32.mrb[8].mxu1 }
 0x16c   :  { %3799 = vpow2.f32 %v3092_v28  ;;  %v3431_v32 = vpop.f32.mrb[9].mxu1  ;;  %v624_v48 = vadd.f32 %v4398_v46, %v604_v31  ;;  %v3704_v28 = vld [vmem:[#allocation9 + $0x50] ss:$12 sps:$4 sm:$0xff]   ;;  %v3705_v31 = vld [vmem:[#allocation9 + $0x68] ss:$12 sps:$4 sm:$0xff]  }
 0x16d   :  { %v607_v35 = vpop.f32.mrb[10].mxu1  ;;  %v3706_v32 = vld [vmem:[#allocation9 + $0x80] ss:$12 sps:$4 sm:$0xff]  }
 0x16e   :  { %v3432_v37 = vpop.f32.mrb[11].mxu1  ;;  %v3708_v35 = vld [vmem:[#allocation9 + $0xb0] ss:$12 sps:$4 sm:$0xff]  }
 0x175   :  { %v3798_v39 = vpop.eup %3797 }
 0x176   :  { %v614_v41 = vadd.f32 1.0, %v3798_v39  ;;  %v3800_v43 = vpop.eup %3799 }
 0x177   :  { %v621_v47 = vadd.f32 1.0, %v3800_v43 }
 0x178   :  { %3801 = vrcp.f32 %v614_v41 }
 0x179   :  { %3803 = vrcp.f32 %v621_v47 }
 0x182   :  { %v3802_v49 = vpop.eup %3801 }
 0x183   :  { %v625_v52 = vmul.f32 %v3802_v49, %v624_v48  ;;  %v3804_v58 = vpop.eup %3803 }
 0x184   :  { %v628_v60 = vsub.f32 1.0, %v3804_v58  ;;  %v630_v63 = vmul.f32 0.0, %v3804_v58 }
 0x185   :  { %v626_v55 = vadd.f32 %v625_v52, %v305_v45 }
 0x187   :  { %3805 = vtanh.f32 %v626_v55 }
 0x191   :  { %v3806_v62 = vpop.eup %3805 }
 0x192   :  { %v629_v9 = vmul.f32 %v3806_v62, %v628_v60 }
 0x194   :  { %v4402_v14 = vadd.f32 %v630_v63, %v629_v9 }
 0x196   :  { %v637_v18 = vpack.c.bf16 %v4402_v14, %v4402_v14 }
 0x198   :  { %831 = vmatmul.mubr.bf16.vlgmr.msra.gmra.mrb[20].mxu0 %v637_v18  ;;  %3450 = vmatmul.mubr.bf16.vlgmr.msra.gmra.mrb[12].mxu1 %v637_v18 }
 0x199   :  { %1069 = vmatpush1.bf16.msra.mxu0 %v4240_v4  ;;  %1100 = vmatprep.mubr.bf16.mxu0 %v4088_v0 }
 0x19a   :  { %1070 = vmatprep.subr.bf16.mxu0 %v4244_v6  ;;  %3469 = vmatprep.mubr.msk.bf16.mxu1 %vm4090_vm1, %v4089_v16 }
 0x19b   :  { %3454 = vmatpush3.bf16.msra.mxu1 %v3701_v56 }
 0x19c   :  { %3455 = vmatprep.subr.bf16.mxu1 %v4089_v16 }
 0x19d   :  { %1071 = vmatpush1.bf16.msra.mxu0 %v4250_v7 }
 0x19e   :  { %1072 = vmatprep.subr.bf16.mxu0 %v4254_v8 }
 0x19f   :  { %3456 = vmatpush3.bf16.msra.mxu1 %v3702_v3 }
 0x1a0   :  { %3457 = vmatprep.subr.bf16.mxu1 %v4089_v16 }
 0x1a1   :  { %1073 = vmatpush1.bf16.msra.mxu0 %v4256_v10 }
 0x1a2   :  { %1074 = vmatprep.subr.bf16.mxu0 %v4260_v12 }
 0x1a3   :  { %3458 = vmatpush3.bf16.msra.mxu1 %v3703_v23 }
 0x1a4   :  { %3459 = vmatprep.subr.bf16.mxu1 %v4089_v16 }
 0x1a5   :  { %1075 = vmatpush1.bf16.msra.mxu0 %v4263_v13 }
 0x1a6   :  { %1076 = vmatprep.subr.bf16.mxu0 %v4267_v15 }
 0x1a7   :  { %3460 = vmatpush3.bf16.msra.mxu1 %v3704_v28 }
 0x1a8   :  { %3461 = vmatprep.subr.bf16.mxu1 %v4089_v16 }
 0x1a9   :  { %1077 = vmatpush1.bf16.msra.mxu0 %v4274_v19 }
 0x1aa   :  { %1078 = vmatprep.subr.bf16.mxu0 %v4278_v20 }
 0x1ab   :  { %3462 = vmatpush3.bf16.msra.mxu1 %v3705_v31 }
 0x1ac   :  { %3463 = vmatprep.subr.bf16.mxu1 %v4089_v16 }
 0x1ad   :  { %1079 = vmatpush1.bf16.msra.mxu0 %v4280_v21 }
 0x1ae   :  { %1080 = vmatprep.subr.bf16.mxu0 %v4286_v24 }
 0x1af   :  { %3464 = vmatpush3.bf16.msra.mxu1 %v3706_v32 }
 0x1b0   :  { %3465 = vmatprep.subr.bf16.mxu1 %v4089_v16 }
 0x1b1   :  { %1081 = vmatpush1.bf16.msra.mxu0 %v4289_v25 }
 0x1b2   :  { %1082 = vmatprep.subr.bf16.mxu0 %v4292_v27 }
 0x1b5   :  { %1083 = vmatpush1.bf16.msra.mxu0 %v4299_v29 }
 0x1b6   :  { %1338 = vmatprep.subr.bf16.mxu0 %v4242_v5  ;;  %v3707_v5 = vld [vmem:[#allocation9 + $0x98] ss:$12 sps:$4 sm:$0xff]  }
 0x1b7   :  { %3466 = vmatpush3.bf16.msra.mxu1 %v3707_v5 }
 0x1b8   :  { %3467 = vmatprep.subr.bf16.mxu1 %v4089_v16 }
 0x1bb   :  { %3468 = vmatpush3.bf16.msra.mxu1 %v3708_v35 }
 0x1bc   :  { %3473 = vmatprep.subr.bf16.mxu1 %v4089_v16 }
 0x26b   :  { %v832_v37 = vpop.f32.mrb[20].mxu0  ;;  %v873_v39 = vpop.f32.mrb[12].mxu1 }
 0x26c   :  { %v879_v41 = vadd.f32 %v832_v37, %v4344_v51  ;;  %v834_v43 = vpop.f32.mrb[21].mxu0  ;;  %v3451_v47 = vpop.f32.mrb[13].mxu1  ;;  %v893_v56 = vadd.f32 %v4398_v46, %v873_v39 }
 0x26d   :  { %v886_v48 = vadd.f32 %v834_v43, %v4346_v53  ;;  %v836_v49 = vpop.f32.mrb[22].mxu0  ;;  %v876_v45 = vpop.f32.mrb[14].mxu1 }
 0x26e   :  { %v3117_v52 = vmul.f32 -1.442695, %v879_v41  ;;  %v837_v55 = vpop.f32.mrb[23].mxu0  ;;  %v3452_v58 = vpop.f32.mrb[15].mxu1 }
 0x26f   :  { %v3118_v60 = vmul.f32 -1.442695, %v886_v48 }
 0x270   :  { %3807 = vpow2.f32 %v3117_v52 }
 0x271   :  { %3809 = vpow2.f32 %v3118_v60 }
 0x27a   :  { %v3808_v62 = vpop.eup %3807 }
 0x27b   :  { %v883_v63 = vadd.f32 1.0, %v3808_v62  ;;  %v3810_v9 = vpop.eup %3809 }
 0x27c   :  { %v890_v18 = vadd.f32 1.0, %v3810_v9 }
 0x27d   :  { %3811 = vrcp.f32 %v883_v63 }
 0x27e   :  { %3813 = vrcp.f32 %v890_v18 }
 0x287   :  { %v3812_v51 = vpop.eup %3811 }
 0x288   :  { %v894_v3 = vmul.f32 %v3812_v51, %v893_v56  ;;  %v3814_v23 = vpop.eup %3813 }
 0x289   :  { %v897_v28 = vsub.f32 1.0, %v3814_v23  ;;  %v899_v32 = vmul.f32 %v3814_v23, %v4402_v14  ;;  %v4486_v23 = vld [vmem:[#allocation9 + $0x1c] ss:$12 sps:$4 sm:$0xff]  }
 0x28a   :  { %v895_v53 = vadd.f32 %v894_v3, %v4365_v17  ;;  %v4482_v3 = vld [vmem:[#allocation9] ss:$12 sps:$4 sm:$0xff]  }
 0x28c   :  { %3815 = vtanh.f32 %v895_v53  ;;  %v3720_v53 = vld [vmem:[#allocation9 + $0x8] ss:$12 sps:$4 sm:$0xff]  }
 0x296   :  { %v3816_v31 = vpop.eup %3815 }
 0x297   :  { %v898_v5 = vmul.f32 %v3816_v31, %v897_v28  ;;  %v4489_v28 = vld [vmem:[#allocation9 + $0x18] ss:$12 sps:$4 sm:$0xff]   ;;  %v3724_v31 = vld [vmem:[#allocation9 + $0x20] ss:$12 sps:$4 sm:$0xff]  }
 0x299   :  { %v4438_v35 = vadd.f32 %v899_v32, %v898_v5  ;;  %v4493_v32 = vld [vmem:[#allocation9 + $0x34] ss:$12 sps:$4 sm:$0xff]   ;;  %v4496_v5 = vld [vmem:[#allocation9 + $0x30] ss:$12 sps:$4 sm:$0xff]  }
 0x29b   :  { %v907_v37 = vpack.c.bf16 %v4438_v35, %v4438_v35 }
 0x29d   :  { %1101 = vmatmul.mubr.bf16.vlgmr.msra.gmra.mrb[24].mxu0 %v907_v37  ;;  %3470 = vmatmul.mubr.bf16.vlgmr.msra.gmra.mrb[16].mxu1 %v907_v37  ;;  %v3728_v37 = vld [vmem:[#allocation9 + $0x38] ss:$12 sps:$4 sm:$0xff]  }
 0x29e   :  { %1339 = vmatpush1.bf16.msra.mxu0 %v4240_v4  ;;  %1370 = vmatprep.mubr.bf16.mxu0 %v4088_v0  ;;  %v3709_v4 = vld [vmem:[#allocation9 + $0x8] ss:$12 sps:$4 sm:$0xff]  }
 0x29f   :  { %1340 = vmatprep.subr.bf16.mxu0 %v4244_v6  ;;  %3489 = vmatprep.mubr.msk.bf16.mxu1 %vm4090_vm1, %v4089_v16  ;;  %v3710_v6 = vld [vmem:[#allocation9 + $0x20] ss:$12 sps:$4 sm:$0xff]  }
 0x2a0   :  { %3474 = vmatpush3.bf16.msra.mxu1 %v3709_v4  ;;  %v4500_v4 = vld [vmem:[#allocation9 + $0x4c] ss:$12 sps:$4 sm:$0xff]  }
 0x2a1   :  { %3475 = vmatprep.subr.bf16.mxu1 %v4089_v16 }
 0x2a2   :  { %1341 = vmatpush1.bf16.msra.mxu0 %v4250_v7  ;;  %v3711_v7 = vld [vmem:[#allocation9 + $0x38] ss:$12 sps:$4 sm:$0xff]  }
 0x2a3   :  { %1342 = vmatprep.subr.bf16.mxu0 %v4254_v8  ;;  %v3712_v8 = vld [vmem:[#allocation9 + $0x50] ss:$12 sps:$4 sm:$0xff]  }
 0x2a4   :  { %3476 = vmatpush3.bf16.msra.mxu1 %v3710_v6  ;;  %v4503_v6 = vld [vmem:[#allocation9 + $0x48] ss:$12 sps:$4 sm:$0xff]  }
 0x2a5   :  { %3477 = vmatprep.subr.bf16.mxu1 %v4089_v16 }
 0x2a6   :  { %1343 = vmatpush1.bf16.msra.mxu0 %v4256_v10  ;;  %v3713_v10 = vld [vmem:[#allocation9 + $0x68] ss:$12 sps:$4 sm:$0xff]  }
 0x2a7   :  { %1344 = vmatprep.subr.bf16.mxu0 %v4260_v12  ;;  %v3714_v12 = vld [vmem:[#allocation9 + $0x80] ss:$12 sps:$4 sm:$0xff]  }
 0x2a8   :  { %3478 = vmatpush3.bf16.msra.mxu1 %v3711_v7  ;;  %v3732_v7 = vld [vmem:[#allocation9 + $0x50] ss:$12 sps:$4 sm:$0xff]  }
 0x2a9   :  { %3479 = vmatprep.subr.bf16.mxu1 %v4089_v16 }
 0x2aa   :  { %1345 = vmatpush1.bf16.msra.mxu0 %v4263_v13  ;;  %v3715_v13 = vld [vmem:[#allocation9 + $0x98] ss:$12 sps:$4 sm:$0xff]  }
 0x2ab   :  { %1346 = vmatprep.subr.bf16.mxu0 %v4267_v15  ;;  %v3716_v15 = vld [vmem:[#allocation9 + $0xb0] ss:$12 sps:$4 sm:$0xff]  }
 0x2ac   :  { %3480 = vmatpush3.bf16.msra.mxu1 %v3712_v8  ;;  %v4507_v8 = vld [vmem:[#allocation9 + $0x64] ss:$12 sps:$4 sm:$0xff]  }
 0x2ad   :  { %3481 = vmatprep.subr.bf16.mxu1 %v4089_v16 }
 0x2ae   :  { %1347 = vmatpush1.bf16.msra.mxu0 %v4274_v19 }
 0x2af   :  { %1348 = vmatprep.subr.bf16.mxu0 %v4278_v20 }
 0x2b0   :  { %3482 = vmatpush3.bf16.msra.mxu1 %v3713_v10  ;;  %v4510_v10 = vld [vmem:[#allocation9 + $0x60] ss:$12 sps:$4 sm:$0xff]  }
 0x2b1   :  { %3483 = vmatprep.subr.bf16.mxu1 %v4089_v16 }
 0x2b2   :  { %1349 = vmatpush1.bf16.msra.mxu0 %v4280_v21 }
 0x2b3   :  { %1350 = vmatprep.subr.bf16.mxu0 %v4286_v24 }
 0x2b4   :  { %3484 = vmatpush3.bf16.msra.mxu1 %v3714_v12  ;;  %v3736_v12 = vld [vmem:[#allocation9 + $0x68] ss:$12 sps:$4 sm:$0xff]  }
 0x2b5   :  { %3485 = vmatprep.subr.bf16.mxu1 %v4089_v16 }
 0x2b6   :  { %1351 = vmatpush1.bf16.msra.mxu0 %v4289_v25 }
 0x2b7   :  { %1352 = vmatprep.subr.bf16.mxu0 %v4292_v27 }
 0x2b8   :  { %3486 = vmatpush3.bf16.msra.mxu1 %v3715_v13  ;;  %v4513_v13 = vld [vmem:[#allocation9 + $0x7c] ss:$12 sps:$4 sm:$0xff]  }
 0x2b9   :  { %3487 = vmatprep.subr.bf16.mxu1 %v4089_v16 }
 0x2ba   :  { %1353 = vmatpush1.bf16.msra.mxu0 %v4299_v29 }
 0x2bc   :  { %3488 = vmatpush3.bf16.msra.mxu1 %v3716_v15  ;;  %v4516_v15 = vld [vmem:[#allocation9 + $0x78] ss:$12 sps:$4 sm:$0xff]  }
 0x2bd   :  { %3493 = vmatprep.subr.bf16.mxu1 %v4089_v16 }
 0x370   :  { %v1102_v19 = vpop.f32.mrb[24].mxu0  ;;  %v1143_v20 = vpop.f32.mrb[16].mxu1 }
 0x371   :  { %v1149_v21 = vadd.f32 %v1102_v19, %v4350_v57  ;;  %v1104_v24 = vpop.f32.mrb[25].mxu0  ;;  %v3471_v25 = vpop.f32.mrb[17].mxu1  ;;  %v1163_v55 = vadd.f32 %v4398_v46, %v1143_v20  ;;  %v3740_v19 = vld [vmem:[#allocation9 + $0x80] ss:$12 sps:$4 sm:$0xff]  }
 0x372   :  { %v1156_v27 = vadd.f32 %v1104_v24, %v4352_v59  ;;  %v1106_v29 = vpop.f32.mrb[26].mxu0  ;;  %v1146_v17 = vpop.f32.mrb[18].mxu1  ;;  %v4520_v20 = vld [vmem:[#allocation9 + $0x94] ss:$12 sps:$4 sm:$0xff]   ;;  %v3744_v24 = vld [vmem:[#allocation9 + $0x98] ss:$12 sps:$4 sm:$0xff]  }
 0x373   :  { %v3143_v39 = vmul.f32 -1.442695, %v1149_v21  ;;  %v1107_v41 = vpop.f32.mrb[27].mxu0  ;;  %v3472_v43 = vpop.f32.mrb[19].mxu1  ;;  %v4523_v21 = vld [vmem:[#allocation9 + $0x90] ss:$12 sps:$4 sm:$0xff]  }
 0x374   :  { %v3144_v47 = vmul.f32 -1.442695, %v1156_v27  ;;  %v4527_v25 = vld [vmem:[#allocation9 + $0xac] ss:$12 sps:$4 sm:$0xff]   ;;  %v4530_v27 = vld [vmem:[#allocation9 + $0xa8] ss:$12 sps:$4 sm:$0xff]  }
 0x375   :  { %3817 = vpow2.f32 %v3143_v39  ;;  %v3748_v29 = vld [vmem:[#allocation9 + $0xb0] ss:$12 sps:$4 sm:$0xff]  }
 0x376   :  { %3819 = vpow2.f32 %v3144_v47 }
 0x37f   :  { %v3818_v48 = vpop.eup %3817 }
 0x380   :  { %v1153_v49 = vadd.f32 1.0, %v3818_v48  ;;  %v3820_v45 = vpop.eup %3819 }
 0x381   :  { %v1160_v52 = vadd.f32 1.0, %v3820_v45 }
 0x382   :  { %3821 = vrcp.f32 %v1153_v49 }
 0x383   :  { %3823 = vrcp.f32 %v1160_v52 }
 0x38c   :  { %v3822_v57 = vpop.eup %3821 }
 0x38d   :  { %v1164_v58 = vmul.f32 %v3822_v57, %v1163_v55  ;;  %v3824_v60 = vpop.eup %3823 }
 0x38e   :  { %v1167_v62 = vsub.f32 1.0, %v3824_v60  ;;  %v1169_v9 = vmul.f32 %v3824_v60, %v4438_v35 }
 0x38f   :  { %v1165_v59 = vadd.f32 %v1164_v58, %v4359_v2  ;;  %v4480_v2 = vld [vmem:[#allocation9 + $0x4] ss:$12 sps:$4 sm:$0xff]  }
 0x390   :  { %1608 = vmatprep.subr.bf16.mxu0 %v4480_v2 }
 0x391   :  { %3825 = vtanh.f32 %v1165_v59 }
 0x39b   :  { %v3826_v63 = vpop.eup %3825 }
 0x39c   :  { %v1168_v18 = vmul.f32 %v3826_v63, %v1167_v62 }
 0x39e   :  { %v4473_v56 = vadd.f32 %v1169_v9, %v1168_v18 }
 0x3a0   :  { %v1177_v51 = vpack.c.bf16 %v4473_v56, %v4473_v56 }
 0x3a2   :  { %1371 = vmatmul.mubr.bf16.vlgmr.msra.gmra.mrb[28].mxu0 %v1177_v51  ;;  %3490 = vmatmul.mubr.bf16.vlgmr.msra.gmra.mrb[20].mxu1 %v1177_v51 }
 0x3a3   :  { %1640 = vmatprep.mubr.bf16.mxu0 %v4088_v0  ;;  %3509 = vmatprep.mubr.msk.bf16.mxu1 %vm4090_vm1, %v4089_v16 }
 0x3a4   :  { %1609 = vmatpush1.bf16.msra.mxu0 %v4482_v3  ;;  %3494 = vmatpush3.bf16.msra.mxu1 %v3720_v53 }
 0x3a5   :  { %3495 = vmatprep.subr.bf16.mxu1 %v4089_v16  ;;  %1610 = vmatprep.subr.bf16.mxu0 %v4486_v23 }
 0x3a8   :  { %1611 = vmatpush1.bf16.msra.mxu0 %v4489_v28  ;;  %3496 = vmatpush3.bf16.msra.mxu1 %v3724_v31 }
 0x3a9   :  { %3497 = vmatprep.subr.bf16.mxu1 %v4089_v16  ;;  %1612 = vmatprep.subr.bf16.mxu0 %v4493_v32 }
 0x3ac   :  { %1613 = vmatpush1.bf16.msra.mxu0 %v4496_v5  ;;  %3498 = vmatpush3.bf16.msra.mxu1 %v3728_v37 }
 0x3ad   :  { %3499 = vmatprep.subr.bf16.mxu1 %v4089_v16  ;;  %1614 = vmatprep.subr.bf16.mxu0 %v4500_v4 }
 0x3b0   :  { %1615 = vmatpush1.bf16.msra.mxu0 %v4503_v6  ;;  %3500 = vmatpush3.bf16.msra.mxu1 %v3732_v7 }
 0x3b1   :  { %3501 = vmatprep.subr.bf16.mxu1 %v4089_v16  ;;  %1616 = vmatprep.subr.bf16.mxu0 %v4507_v8 }
 0x3b4   :  { %1617 = vmatpush1.bf16.msra.mxu0 %v4510_v10  ;;  %3502 = vmatpush3.bf16.msra.mxu1 %v3736_v12 }
 0x3b5   :  { %1618 = vmatprep.subr.bf16.mxu0 %v4513_v13  ;;  %3503 = vmatprep.subr.bf16.mxu1 %v4089_v16 }
 0x3b8   :  { %1619 = vmatpush1.bf16.msra.mxu0 %v4516_v15  ;;  %3504 = vmatpush3.bf16.msra.mxu1 %v3740_v19 }
 0x3b9   :  { %1620 = vmatprep.subr.bf16.mxu0 %v4520_v20  ;;  %3505 = vmatprep.subr.bf16.mxu1 %v4089_v16 }
 0x3bc   :  { %1621 = vmatpush1.bf16.msra.mxu0 %v4523_v21  ;;  %3506 = vmatpush3.bf16.msra.mxu1 %v3744_v24  ;;  %v3750_v24 = vld [vmem:[#allocation9 + $0x20] ss:$12 sps:$4 sm:$0xff]  }
 0x3bd   :  { %1622 = vmatprep.subr.bf16.mxu0 %v4527_v25  ;;  %3507 = vmatprep.subr.bf16.mxu1 %v4089_v16 }
 0x3c0   :  { %1623 = vmatpush1.bf16.msra.mxu0 %v4530_v27  ;;  %3508 = vmatpush3.bf16.msra.mxu1 %v3748_v29  ;;  %v3751_v29 = vld [vmem:[#allocation9 + $0x38] ss:$12 sps:$4 sm:$0xff]  }
 0x3c1   :  { %1878 = vmatprep.subr.bf16.mxu0 %v4480_v2  ;;  %3513 = vmatprep.subr.bf16.mxu1 %v4089_v16 }
 0x475   :  { %v1372_v17 = vpop.f32.mrb[28].mxu0  ;;  %v1413_v39 = vpop.f32.mrb[20].mxu1 }
 0x476   :  { %v1419_v41 = vadd.f32 %v1372_v17, %v4354_v61  ;;  %v1374_v43 = vpop.f32.mrb[29].mxu0  ;;  %v3491_v47 = vpop.f32.mrb[21].mxu1  ;;  %v1433_v9 = vadd.f32 %v4398_v46, %v1413_v39  ;;  %v3752_v17 = vld [vmem:[#allocation9 + $0x50] ss:$12 sps:$4 sm:$0xff]   ;;  %v3753_v39 = vld [vmem:[#allocation9 + $0x68] ss:$12 sps:$4 sm:$0xff]  }
 0x477   :  { %v1426_v48 = vadd.f32 %v1374_v43, %v4356_v1  ;;  %v1376_v49 = vpop.f32.mrb[30].mxu0  ;;  %v1416_v45 = vpop.f32.mrb[22].mxu1  ;;  %v3755_v43 = vld [vmem:[#allocation9 + $0x98] ss:$12 sps:$4 sm:$0xff]   ;;  %v3756_v47 = vld [vmem:[#allocation9 + $0xb0] ss:$12 sps:$4 sm:$0xff]  }
 0x478   :  { %v3169_v52 = vmul.f32 -1.442695, %v1419_v41  ;;  %v1377_v55 = vpop.f32.mrb[31].mxu0  ;;  %v3492_v57 = vpop.f32.mrb[23].mxu1  ;;  %v3754_v41 = vld [vmem:[#allocation9 + $0x80] ss:$12 sps:$4 sm:$0xff]  }
 0x479   :  { %v3170_v58 = vmul.f32 -1.442695, %v1426_v48 }
 0x47a   :  { %3827 = vpow2.f32 %v3169_v52 }
 0x47b   :  { %3829 = vpow2.f32 %v3170_v58 }
 0x484   :  { %v3828_v59 = vpop.eup %3827 }
 0x485   :  { %v1423_v60 = vadd.f32 1.0, %v3828_v59  ;;  %v3830_v62 = vpop.eup %3829 }
 0x486   :  { %v1430_v63 = vadd.f32 1.0, %v3830_v62 }
 0x487   :  { %3831 = vrcp.f32 %v1423_v60 }
 0x488   :  { %3833 = vrcp.f32 %v1430_v63 }
 0x491   :  { %v3832_v61 = vpop.eup %3831 }
 0x492   :  { %v1434_v18 = vmul.f32 %v3832_v61, %v1433_v9  ;;  %v3834_v51 = vpop.eup %3833 }
 0x493   :  { %v1437_v53 = vsub.f32 1.0, %v3834_v51  ;;  %v1439_v37 = vmul.f32 %v3834_v51, %v4473_v56 }
 0x494   :  { %v1435_v1 = vadd.f32 %v1434_v18, %v4362_v11  ;;  %v3749_v11 = vld [vmem:[#allocation9 + $0x8] ss:$12 sps:$4 sm:$0xff]  }
 0x496   :  { %3835 = vtanh.f32 %v1435_v1 }
 0x4a0   :  { %v3836_v31 = vpop.eup %3835 }
 0x4a1   :  { %v1438_v7 = vmul.f32 %v3836_v31, %v1437_v53 }
 0x4a3   :  { %v4542_v12 = vadd.f32 %v1439_v37, %v1438_v7 }
 0x4a5   :  { %v1447_v19 = vpack.c.bf16 %v4542_v12, %v4542_v12 }
 0x4a7   :  { %1641 = vmatmul.mubr.bf16.vlgmr.msra.gmra.mrb[32].mxu0 %v1447_v19  ;;  %3510 = vmatmul.mubr.bf16.vlgmr.msra.gmra.mrb[24].mxu1 %v1447_v19 }
 0x4a8   :  { %1879 = vmatpush1.bf16.msra.mxu0 %v4482_v3  ;;  %1910 = vmatprep.mubr.bf16.mxu0 %v4088_v0 }
 0x4a9   :  { %1880 = vmatprep.subr.bf16.mxu0 %v4486_v23  ;;  %3529 = vmatprep.mubr.msk.bf16.mxu1 %vm4090_vm1, %v4089_v16 }
 0x4aa   :  { %3514 = vmatpush3.bf16.msra.mxu1 %v3749_v11 }
 0x4ab   :  { %3515 = vmatprep.subr.bf16.mxu1 %v4089_v16 }
 0x4ac   :  { %1881 = vmatpush1.bf16.msra.mxu0 %v4489_v28 }
 0x4ad   :  { %1882 = vmatprep.subr.bf16.mxu0 %v4493_v32 }
 0x4ae   :  { %3516 = vmatpush3.bf16.msra.mxu1 %v3750_v24 }
 0x4af   :  { %3517 = vmatprep.subr.bf16.mxu1 %v4089_v16 }
 0x4b0   :  { %1883 = vmatpush1.bf16.msra.mxu0 %v4496_v5 }
 0x4b1   :  { %1884 = vmatprep.subr.bf16.mxu0 %v4500_v4 }
 0x4b2   :  { %3518 = vmatpush3.bf16.msra.mxu1 %v3751_v29 }
 0x4b3   :  { %3519 = vmatprep.subr.bf16.mxu1 %v4089_v16 }
 0x4b4   :  { %1885 = vmatpush1.bf16.msra.mxu0 %v4503_v6 }
 0x4b5   :  { %1886 = vmatprep.subr.bf16.mxu0 %v4507_v8 }
 0x4b6   :  { %3520 = vmatpush3.bf16.msra.mxu1 %v3752_v17 }
 0x4b7   :  { %3521 = vmatprep.subr.bf16.mxu1 %v4089_v16 }
 0x4b8   :  { %1887 = vmatpush1.bf16.msra.mxu0 %v4510_v10 }
 0x4b9   :  { %1888 = vmatprep.subr.bf16.mxu0 %v4513_v13 }
 0x4ba   :  { %3522 = vmatpush3.bf16.msra.mxu1 %v3753_v39  ;;  %v3758_v39 = vld [vmem:[#allocation9 + $0x20] ss:$12 sps:$4 sm:$0xff]  }
 0x4bb   :  { %3523 = vmatprep.subr.bf16.mxu1 %v4089_v16 }
 0x4bc   :  { %1889 = vmatpush1.bf16.msra.mxu0 %v4516_v15 }
 0x4bd   :  { %1890 = vmatprep.subr.bf16.mxu0 %v4520_v20 }
 0x4be   :  { %3524 = vmatpush3.bf16.msra.mxu1 %v3754_v41  ;;  %v3759_v41 = vld [vmem:[#allocation9 + $0x38] ss:$12 sps:$4 sm:$0xff]  }
 0x4bf   :  { %3525 = vmatprep.subr.bf16.mxu1 %v4089_v16 }
 0x4c0   :  { %1891 = vmatpush1.bf16.msra.mxu0 %v4523_v21 }
 0x4c1   :  { %1892 = vmatprep.subr.bf16.mxu0 %v4527_v25 }
 0x4c2   :  { %3526 = vmatpush3.bf16.msra.mxu1 %v3755_v43  ;;  %v3760_v43 = vld [vmem:[#allocation9 + $0x50] ss:$12 sps:$4 sm:$0xff]  }
 0x4c3   :  { %3527 = vmatprep.subr.bf16.mxu1 %v4089_v16 }
 0x4c4   :  { %1893 = vmatpush1.bf16.msra.mxu0 %v4530_v27 }
 0x4c5   :  { %2148 = vmatprep.subr.bf16.mxu0 %v4480_v2 }
 0x4c6   :  { %3528 = vmatpush3.bf16.msra.mxu1 %v3756_v47  ;;  %v3761_v47 = vld [vmem:[#allocation9 + $0x68] ss:$12 sps:$4 sm:$0xff]  }
 0x4c7   :  { %3533 = vmatprep.subr.bf16.mxu1 %v4089_v16 }
 0x57a   :  { %v1642_v48 = vpop.f32.mrb[32].mxu0  ;;  %v1683_v49 = vpop.f32.mrb[24].mxu1 }
 0x57b   :  { %v1689_v45 = vadd.f32 %v1642_v48, %v4367_v22  ;;  %v1644_v52 = vpop.f32.mrb[33].mxu0  ;;  %v3511_v55 = vpop.f32.mrb[25].mxu1  ;;  %v1703_v53 = vadd.f32 %v4398_v46, %v1683_v49  ;;  %v3762_v48 = vld [vmem:[#allocation9 + $0x80] ss:$12 sps:$4 sm:$0xff]   ;;  %v3764_v49 = vld [vmem:[#allocation9 + $0xb0] ss:$12 sps:$4 sm:$0xff]  }
 0x57c   :  { %v1696_v57 = vadd.f32 %v1644_v52, %v4369_v26  ;;  %v1646_v58 = vpop.f32.mrb[34].mxu0  ;;  %v1686_v59 = vpop.f32.mrb[26].mxu1 }
 0x57d   :  { %v3195_v60 = vmul.f32 -1.442695, %v1689_v45  ;;  %v1647_v62 = vpop.f32.mrb[35].mxu0  ;;  %v3512_v63 = vpop.f32.mrb[27].mxu1 }
 0x57e   :  { %v3196_v9 = vmul.f32 -1.442695, %v1696_v57 }
 0x57f   :  { %3837 = vpow2.f32 %v3195_v60 }
 0x580   :  { %3839 = vpow2.f32 %v3196_v9 }
 0x589   :  { %v3838_v61 = vpop.eup %3837 }
 0x58a   :  { %v1693_v18 = vadd.f32 1.0, %v3838_v61  ;;  %v3840_v1 = vpop.eup %3839 }
 0x58b   :  { %v1700_v51 = vadd.f32 1.0, %v3840_v1 }
 0x58c   :  { %3841 = vrcp.f32 %v1693_v18 }
 0x58d   :  { %3843 = vrcp.f32 %v1700_v51 }
 0x596   :  { %v3842_v22 = vpop.eup %3841 }
 0x597   :  { %v1704_v31 = vmul.f32 %v3842_v22, %v1703_v53  ;;  %v3844_v37 = vpop.eup %3843 }
 0x598   :  { %v1707_v7 = vsub.f32 1.0, %v3844_v37  ;;  %v1709_v11 = vmul.f32 %v3844_v37, %v4542_v12 }
 0x599   :  { %v1705_v26 = vadd.f32 %v1704_v31, %v4379_v36  ;;  %v3757_v36 = vld [vmem:[#allocation9 + $0x8] ss:$12 sps:$4 sm:$0xff]  }
 0x59b   :  { %3845 = vtanh.f32 %v1705_v26 }
 0x5a5   :  { %v3846_v19 = vpop.eup %3845 }
 0x5a6   :  { %v1708_v24 = vmul.f32 %v3846_v19, %v1707_v7 }
 0x5a8   :  { %v4578_v29 = vadd.f32 %v1709_v11, %v1708_v24 }
 0x5aa   :  { %v1717_v17 = vpack.c.bf16 %v4578_v29, %v4578_v29 }
 0x5ac   :  { %1911 = vmatmul.mubr.bf16.vlgmr.msra.gmra.mrb[36].mxu0 %v1717_v17  ;;  %3530 = vmatmul.mubr.bf16.vlgmr.msra.gmra.mrb[28].mxu1 %v1717_v17 }
 0x5ad   :  { %2149 = vmatpush1.bf16.msra.mxu0 %v4482_v3  ;;  %2180 = vmatprep.mubr.bf16.mxu0 %v4088_v0 }
 0x5ae   :  { %2150 = vmatprep.subr.bf16.mxu0 %v4486_v23  ;;  %3549 = vmatprep.mubr.msk.bf16.mxu1 %vm4090_vm1, %v4089_v16 }
 0x5af   :  { %3534 = vmatpush3.bf16.msra.mxu1 %v3757_v36 }
 0x5b0   :  { %3535 = vmatprep.subr.bf16.mxu1 %v4089_v16 }
 0x5b1   :  { %2151 = vmatpush1.bf16.msra.mxu0 %v4489_v28 }
 0x5b2   :  { %2152 = vmatprep.subr.bf16.mxu0 %v4493_v32 }
 0x5b3   :  { %3536 = vmatpush3.bf16.msra.mxu1 %v3758_v39 }
 0x5b4   :  { %3537 = vmatprep.subr.bf16.mxu1 %v4089_v16 }
 0x5b5   :  { %2153 = vmatpush1.bf16.msra.mxu0 %v4496_v5 }
 0x5b6   :  { %2154 = vmatprep.subr.bf16.mxu0 %v4500_v4 }
 0x5b7   :  { %3538 = vmatpush3.bf16.msra.mxu1 %v3759_v41 }
 0x5b8   :  { %3539 = vmatprep.subr.bf16.mxu1 %v4089_v16 }
 0x5b9   :  { %2155 = vmatpush1.bf16.msra.mxu0 %v4503_v6 }
 0x5ba   :  { %2156 = vmatprep.subr.bf16.mxu0 %v4507_v8 }
 0x5bb   :  { %3540 = vmatpush3.bf16.msra.mxu1 %v3760_v43 }
 0x5bc   :  { %3541 = vmatprep.subr.bf16.mxu1 %v4089_v16 }
 0x5bd   :  { %2157 = vmatpush1.bf16.msra.mxu0 %v4510_v10 }
 0x5be   :  { %2158 = vmatprep.subr.bf16.mxu0 %v4513_v13 }
 0x5bf   :  { %3542 = vmatpush3.bf16.msra.mxu1 %v3761_v47 }
 0x5c0   :  { %3543 = vmatprep.subr.bf16.mxu1 %v4089_v16 }
 0x5c1   :  { %2159 = vmatpush1.bf16.msra.mxu0 %v4516_v15 }
 0x5c2   :  { %2160 = vmatprep.subr.bf16.mxu0 %v4520_v20 }
 0x5c3   :  { %3544 = vmatpush3.bf16.msra.mxu1 %v3762_v48 }
 0x5c4   :  { %3545 = vmatprep.subr.bf16.mxu1 %v4089_v16 }
 0x5c5   :  { %2161 = vmatpush1.bf16.msra.mxu0 %v4523_v21 }
 0x5c6   :  { %2162 = vmatprep.subr.bf16.mxu0 %v4527_v25 }
 0x5c9   :  { %2163 = vmatpush1.bf16.msra.mxu0 %v4530_v27 }
 0x5ca   :  { %2418 = vmatprep.subr.bf16.mxu0 %v4480_v2  ;;  %v3763_v2 = vld [vmem:[#allocation9 + $0x98] ss:$12 sps:$4 sm:$0xff]  }
 0x5cb   :  { %3546 = vmatpush3.bf16.msra.mxu1 %v3763_v2 }
 0x5cc   :  { %3547 = vmatprep.subr.bf16.mxu1 %v4089_v16 }
 0x5cf   :  { %3548 = vmatpush3.bf16.msra.mxu1 %v3764_v49 }
 0x5d0   :  { %3553 = vmatprep.subr.bf16.mxu1 %v4089_v16 }
 0x67f   :  { %v1912_v45 = vpop.f32.mrb[36].mxu0  ;;  %v1953_v52 = vpop.f32.mrb[28].mxu1 }
 0x680   :  { %v1959_v55 = vadd.f32 %v1912_v45, %v4371_v30  ;;  %v1914_v57 = vpop.f32.mrb[37].mxu0  ;;  %v3531_v58 = vpop.f32.mrb[29].mxu1  ;;  %v1973_v31 = vadd.f32 %v4398_v46, %v1953_v52 }
 0x681   :  { %v1966_v59 = vadd.f32 %v1914_v57, %v4373_v33  ;;  %v1916_v60 = vpop.f32.mrb[38].mxu0  ;;  %v1956_v62 = vpop.f32.mrb[30].mxu1 }
 0x682   :  { %v3221_v63 = vmul.f32 -1.442695, %v1959_v55  ;;  %v1917_v9 = vpop.f32.mrb[39].mxu0  ;;  %v3532_v61 = vpop.f32.mrb[31].mxu1 }
 0x683   :  { %v3222_v18 = vmul.f32 -1.442695, %v1966_v59  ;;  %v3775_v9 = vld [vmem:[#allocation10 + $0x10] sm:$0xff]   ;;  %v3776_v61 = vld [vmem:[#allocation10 + $0x18] sm:$0xff]  }
 0x684   :  { %3847 = vpow2.f32 %v3221_v63 }
 0x685   :  { %3849 = vpow2.f32 %v3222_v18  ;;  %v3777_v18 = vld [vmem:[#allocation10 + $0x20] sm:$0xff]  }
 0x68e   :  { %v3848_v1 = vpop.eup %3847 }
 0x68f   :  { %v1963_v51 = vadd.f32 1.0, %v3848_v1  ;;  %v3850_v53 = vpop.eup %3849  ;;  %v3778_v1 = vld [vmem:[#allocation10 + $0x28] sm:$0xff]  }
 0x690   :  { %v1970_v22 = vadd.f32 1.0, %v3850_v53  ;;  %v3780_v53 = vld [vmem:[#allocation10 + $0x38] sm:$0xff]  }
 0x691   :  { %3851 = vrcp.f32 %v1963_v51  ;;  %v3779_v51 = vld [vmem:[#allocation10 + $0x30] sm:$0xff]  }
 0x692   :  { %3853 = vrcp.f32 %v1970_v22  ;;  %v3781_v22 = vld [vmem:[#allocation13] sm:$0xff]  }
 0x69b   :  { %v3852_v30 = vpop.eup %3851 }
 0x69c   :  { %v1974_v26 = vmul.f32 %v3852_v30, %v1973_v31  ;;  %v3854_v37 = vpop.eup %3853  ;;  %v3782_v31 = vld [vmem:[#allocation13 + $0x8] sm:$0xff]   ;;  %v3783_v30 = vld [vmem:[#allocation13 + $0x10] sm:$0xff]  }
 0x69d   :  { %v1977_v7 = vsub.f32 1.0, %v3854_v37  ;;  %v1979_v11 = vmul.f32 %v3854_v37, %v4578_v29  ;;  %v3786_v37 = vld [vmem:[#allocation13 + $0x28] sm:$0xff]  }
 0x69e   :  { %v1975_v33 = vadd.f32 %v1974_v26, %v4385_v40  ;;  %v3766_v40 = vld [vmem:[#allocation9 + $0x20] ss:$12 sps:$4 sm:$0xff]   ;;  %v3784_v26 = vld [vmem:[#allocation13 + $0x18] sm:$0xff]  }
 0x6a0   :  { %3855 = vtanh.f32 %v1975_v33  ;;  %v3785_v33 = vld [vmem:[#allocation13 + $0x20] sm:$0xff]  }
 0x6aa   :  { %v3856_v19 = vpop.eup %3855 }
 0x6ab   :  { %v1978_v24 = vmul.f32 %v3856_v19, %v1977_v7  ;;  %v3787_v7 = vld [vmem:[#allocation13 + $0x30] sm:$0xff]  }
 0x6ad   :  { %v4614_v17 = vadd.f32 %v1979_v11, %v1978_v24 }
 0x6af   :  { %v1987_v36 = vpack.c.bf16 %v4614_v17, %v4614_v17 }
 0x6b1   :  { %2181 = vmatmul.mubr.bf16.vlgmr.msra.gmra.mrb[40].mxu0 %v1987_v36  ;;  %3550 = vmatmul.mubr.bf16.vlgmr.msra.gmra.mrb[32].mxu1 %v1987_v36 }
 0x6b2   :  { %2419 = vmatpush1.bf16.msra.mxu0 %v4482_v3  ;;  %2450 = vmatprep.mubr.bf16.mxu0 %v4088_v0  ;;  %v3765_v0 = vld [vmem:[#allocation9 + $0x8] ss:$12 sps:$4 sm:$0xff]   ;;  %v3767_v3 = vld [vmem:[#allocation9 + $0x38] ss:$12 sps:$4 sm:$0xff]  }
 0x6b3   :  { %2420 = vmatprep.subr.bf16.mxu0 %v4486_v23  ;;  %3569 = vmatprep.mubr.msk.bf16.mxu1 %vm4090_vm1, %v4089_v16  ;;  %v3768_v23 = vld [vmem:[#allocation9 + $0x50] ss:$12 sps:$4 sm:$0xff]  }
 0x6b4   :  { %3554 = vmatpush3.bf16.msra.mxu1 %v3765_v0 }
 0x6b5   :  { %3555 = vmatprep.subr.bf16.mxu1 %v4089_v16 }
 0x6b6   :  { %2421 = vmatpush1.bf16.msra.mxu0 %v4489_v28  ;;  %v3769_v28 = vld [vmem:[#allocation9 + $0x68] ss:$12 sps:$4 sm:$0xff]  }
 0x6b7   :  { %2422 = vmatprep.subr.bf16.mxu0 %v4493_v32  ;;  %v3770_v32 = vld [vmem:[#allocation9 + $0x80] ss:$12 sps:$4 sm:$0xff]  }
 0x6b8   :  { %3556 = vmatpush3.bf16.msra.mxu1 %v3766_v40 }
 0x6b9   :  { %3557 = vmatprep.subr.bf16.mxu1 %v4089_v16 }
 0x6ba   :  { %2423 = vmatpush1.bf16.msra.mxu0 %v4496_v5  ;;  %v3771_v5 = vld [vmem:[#allocation9 + $0x98] ss:$12 sps:$4 sm:$0xff]  }
 0x6bb   :  { %2424 = vmatprep.subr.bf16.mxu0 %v4500_v4  ;;  %v3772_v4 = vld [vmem:[#allocation9 + $0xb0] ss:$12 sps:$4 sm:$0xff]  }
 0x6bc   :  { %3558 = vmatpush3.bf16.msra.mxu1 %v3767_v3 }
 0x6bd   :  { %3559 = vmatprep.subr.bf16.mxu1 %v4089_v16 }
 0x6be   :  { %2425 = vmatpush1.bf16.msra.mxu0 %v4503_v6 }
 0x6bf   :  { %2426 = vmatprep.subr.bf16.mxu0 %v4507_v8 }
 0x6c0   :  { %3560 = vmatpush3.bf16.msra.mxu1 %v3768_v23 }
 0x6c1   :  { %3561 = vmatprep.subr.bf16.mxu1 %v4089_v16 }
 0x6c2   :  { %2427 = vmatpush1.bf16.msra.mxu0 %v4510_v10 }
 0x6c3   :  { %2428 = vmatprep.subr.bf16.mxu0 %v4513_v13 }
 0x6c4   :  { %3562 = vmatpush3.bf16.msra.mxu1 %v3769_v28 }
 0x6c5   :  { %3563 = vmatprep.subr.bf16.mxu1 %v4089_v16 }
 0x6c6   :  { %2429 = vmatpush1.bf16.msra.mxu0 %v4516_v15 }
 0x6c7   :  { %2430 = vmatprep.subr.bf16.mxu0 %v4520_v20 }
 0x6c8   :  { %3564 = vmatpush3.bf16.msra.mxu1 %v3770_v32 }
 0x6c9   :  { %3565 = vmatprep.subr.bf16.mxu1 %v4089_v16 }
 0x6ca   :  { %2431 = vmatpush1.bf16.msra.mxu0 %v4523_v21 }
 0x6cb   :  { %2432 = vmatprep.subr.bf16.mxu0 %v4527_v25 }
 0x6cc   :  { %3566 = vmatpush3.bf16.msra.mxu1 %v3771_v5 }
 0x6cd   :  { %3567 = vmatprep.subr.bf16.mxu1 %v4089_v16 }
 0x6ce   :  { %2433 = vmatpush1.bf16.msra.mxu0 %v4530_v27 }
 0x6cf   :  { %3573 = vmatprep.subr.bf16.mxu0 %v4089_v16 }
 0x6d0   :  { %3568 = vmatpush3.bf16.msra.mxu1 %v3772_v4 }
 0x6d1   :  { %3593 = vmatprep.subr.bf16.mxu1 %v4089_v16 }
 0x784   :  { %v2182_v6 = vpop.f32.mrb[40].mxu0  ;;  %v2223_v8 = vpop.f32.mrb[32].mxu1 }
 0x785   :  { %v2229_v10 = vadd.f32 %v2182_v6, %v4387_v42  ;;  %v2184_v13 = vpop.f32.mrb[41].mxu0  ;;  %v3551_v15 = vpop.f32.mrb[33].mxu1  ;;  %v2243_v45 = vadd.f32 %v4398_v46, %v2223_v8  ;;  %v3774_v46 = vld [vmem:[#allocation10 + $0x8] sm:$0xff]  }
 0x786   :  { %v2236_v20 = vadd.f32 %v2184_v13, %v4389_v44  ;;  %v2186_v21 = vpop.f32.mrb[42].mxu0  ;;  %v2226_v25 = vpop.f32.mrb[34].mxu1 }
 0x787   :  { %v3247_v27 = vmul.f32 -1.442695, %v2229_v10  ;;  %v2187_v39 = vpop.f32.mrb[43].mxu0  ;;  %v3552_v41 = vpop.f32.mrb[35].mxu1 }
 0x788   :  { %v3248_v43 = vmul.f32 -1.442695, %v2236_v20 }
 0x789   :  { %3857 = vpow2.f32 %v3247_v27 }
 0x78a   :  { %3859 = vpow2.f32 %v3248_v43 }
 0x793   :  { %v3858_v47 = vpop.eup %3857 }
 0x794   :  { %v2233_v48 = vadd.f32 1.0, %v3858_v47  ;;  %v3860_v2 = vpop.eup %3859 }
 0x795   :  { %v2240_v49 = vadd.f32 1.0, %v3860_v2  ;;  %v3788_v2 = vld [vmem:[#allocation13 + $0x38] sm:$0xff]  }
 0x796   :  { %3861 = vrcp.f32 %v2233_v48 }
 0x797   :  { %3863 = vrcp.f32 %v2240_v49 }
 0x7a0   :  { %v3862_v42 = vpop.eup %3861 }
 0x7a1   :  { %v2244_v52 = vmul.f32 %v3862_v42, %v2243_v45  ;;  %v3864_v55 = vpop.eup %3863 }
 0x7a2   :  { %v2247_v57 = vsub.f32 1.0, %v3864_v55  ;;  %v2249_v59 = vmul.f32 %v3864_v55, %v4614_v17 }
 0x7a3   :  { %v2245_v44 = vadd.f32 %v2244_v52, %v4376_v34  ;;  %v3773_v34 = vld [vmem:[#allocation10] sm:$0xff]  }
 0x7a5   :  { %3865 = vtanh.f32 %v2245_v44 }
 0x7af   :  { %v3866_v58 = vpop.eup %3865 }
 0x7b0   :  { %v2248_v60 = vmul.f32 %v3866_v58, %v2247_v57  ;;  %v2700_v57 = vld [vmem:[%s4736_s9] sm:$0xff] }
 0x7b2   :  { %v4650_v62 = vadd.f32 %v2249_v59, %v2248_v60  ;;  %v2718_v60 = vmul.f32 -6.0, %v2700_v57 }
 0x7b4   :  { %v2257_v63 = vpack.c.bf16 %v4650_v62, %v4650_v62 }
 0x7b6   :  { %2451 = vmatmul.mubr.bf16.vlgmr.msra.gmra.mrb[44].mxu0 %v2257_v63  ;;  %3570 = vmatmul.mubr.bf16.vlgmr.msra.gmra.mrb[36].mxu1 %v2257_v63 }
 0x7b7   :  { %3589 = vmatprep.mubr.msk.bf16.mxu0 %vm4090_vm1, %v4089_v16  ;;  %3609 = vmatprep.mubr.msk.bf16.mxu1 %vm4090_vm1, %v4089_v16 }
 0x7b8   :  { %3574 = vmatpush3.bf16.msra.mxu0 %v3773_v34  ;;  %3594 = vmatpush3.bf16.msra.mxu1 %v3781_v22 }
 0x7b9   :  { %3575 = vmatprep.subr.bf16.mxu0 %v4089_v16  ;;  %3595 = vmatprep.subr.bf16.mxu1 %v4089_v16 }
 0x7bc   :  { %3576 = vmatpush3.bf16.msra.mxu0 %v3774_v46  ;;  %3596 = vmatpush3.bf16.msra.mxu1 %v3782_v31  ;;  %v2719_v46 = vmul.f32 1.442695, %v2718_v60 }
 0x7bd   :  { %3577 = vmatprep.subr.bf16.mxu0 %v4089_v16  ;;  %3597 = vmatprep.subr.bf16.mxu1 %v4089_v16 }
 0x7c0   :  { %3578 = vmatpush3.bf16.msra.mxu0 %v3775_v9  ;;  %3598 = vmatpush3.bf16.msra.mxu1 %v3783_v30  ;;  %v2733_v9 = vmul.f32 -5.0, %v2700_v57  ;;  %v2763_v30 = vmul.f32 -3.0, %v2700_v57 }
 0x7c1   :  { %3579 = vmatprep.subr.bf16.mxu0 %v4089_v16  ;;  %3599 = vmatprep.subr.bf16.mxu1 %v4089_v16 }
 0x7c4   :  { %3580 = vmatpush3.bf16.msra.mxu0 %v3776_v61  ;;  %3600 = vmatpush3.bf16.msra.mxu1 %v3784_v26  ;;  %v2764_v26 = vmul.f32 1.442695, %v2763_v30 }
 0x7c5   :  { %3581 = vmatprep.subr.bf16.mxu0 %v4089_v16  ;;  %3601 = vmatprep.subr.bf16.mxu1 %v4089_v16 }
 0x7c8   :  { %3582 = vmatpush3.bf16.msra.mxu0 %v3777_v18  ;;  %3602 = vmatpush3.bf16.msra.mxu1 %v3785_v33  ;;  %v2703_v18 = vmul.f32 -7.0, %v2700_v57  ;;  %v2778_v33 = vmul.f32 -2.0, %v2700_v57 }
 0x7c9   :  { %3583 = vmatprep.subr.bf16.mxu0 %v4089_v16  ;;  %3603 = vmatprep.subr.bf16.mxu1 %v4089_v16 }
 0x7ca   :  { %v2704_v22 = vmul.f32 1.442695, %v2703_v18 }
 0x7cc   :  { %3584 = vmatpush3.bf16.msra.mxu0 %v3778_v1  ;;  %3604 = vmatpush3.bf16.msra.mxu1 %v3786_v37 }
 0x7cd   :  { %3585 = vmatprep.subr.bf16.mxu0 %v4089_v16  ;;  %3605 = vmatprep.subr.bf16.mxu1 %v4089_v16 }
 0x7d0   :  { %3586 = vmatpush3.bf16.msra.mxu0 %v3779_v51  ;;  %3606 = vmatpush3.bf16.msra.mxu1 %v3787_v7  ;;  %v2734_v51 = vmul.f32 1.442695, %v2733_v9  ;;  %v2699_v7 = vld [vmem:[%s4735_s8] sm:$0xff]  ;;  %s4091_s8 = smov [#allocation15]  }
 0x7d1   :  { %3587 = vmatprep.subr.bf16.mxu0 %v4089_v16  ;;  %3607 = vmatprep.subr.bf16.mxu1 %v4089_v16  ;;  %s3039_s5 = sshll.u32 %s4091_s8, 4  ;;  %s3040_s5 = int_to_ptr.vmem [resolvable:$true] %s3039_s5 }
 0x7d2   :  { %s4046_s28 = scalar_lea.vmem %s3040_s5, 128  ;;  %p4051_p7 = scmp.lt.s32.totalorder %s3040_s5, %s3040_s5 }
 0x7d3   :  { %p4047_p6 = scmp.ne.s32.totalorder %s3040_s5, %s4046_s28  ;;  %p4052_p8 = scmp.lt.s32.totalorder %s4046_s28, %s4046_s28 }
 0x7d4   :  { %3588 = vmatpush3.bf16.msra.mxu0 %v3780_v53  ;;  %3608 = vmatpush3.bf16.msra.mxu1 %v3788_v2  ;;  %v2748_v53 = vmul.f32 -4.0, %v2700_v57  ;;  %v3796_v2 = vld [vmem:[#allocation12 + $0x38] sm:$0xff]  }
 0x7d5   :  { %3613 = vmatprep.subr.bf16.mxu1 %v4089_v16  ;;  %p4053_p9 = por %p4052_p8, %p4051_p7 }
 0x7d6   :  { %v2749_v31 = vmul.f32 1.442695, %v2748_v53 }
 0x7d7   :  { %p4054_p10 = pnand %p4053_p9, %p4047_p6 }
 0x889   :  { %v2452_v19 = vpop.f32.mrb[44].mxu0  ;;  %v2493_v11 = vpop.f32.mrb[36].mxu1 }
 0x88a   :  { %v2499_v24 = vadd.f32 %v2452_v19, %v4391_v50  ;;  %v2454_v36 = vpop.f32.mrb[45].mxu0  ;;  %v3571_v0 = vpop.f32.mrb[37].mxu1  ;;  %v3913_v50 = vld [vmem:[%s4731_s4] ss:$0 sm:$0xff]  ;;  %v2779_v19 = vmul.f32 1.442695, %v2778_v33 }
 0x88b   :  { %v2506_v40 = vadd.f32 %v2454_v36, %v4393_v54  ;;  %v2456_v3 = vpop.f32.mrb[46].mxu0  ;;  %v2496_v23 = vpop.f32.mrb[38].mxu1  ;;  %v2513_v15 = vadd.f32 %v3913_v50, %v2493_v11  ;;  %v2793_v11 = vmul.f32 -1.0, %v2700_v57 }
 0x88c   :  { %v3273_v28 = vmul.f32 -1.442695, %v2499_v24  ;;  %v2457_v32 = vpop.f32.mrb[47].mxu0  ;;  %v3572_v5 = vpop.f32.mrb[39].mxu1  ;;  %v2808_v3 = vmul.f32 -0.0, %v2700_v57 }
 0x88d   :  { %v3274_v4 = vmul.f32 -1.442695, %v2506_v40  ;;  %v2794_v40 = vmul.f32 1.442695, %v2793_v11 }
 0x88e   :  { %3867 = vpow2.f32 %v3273_v28  ;;  %v2809_v5 = vmul.f32 1.442695, %v2808_v3 }
 0x88f   :  { %3869 = vpow2.f32 %v3274_v4 }
 0x898   :  { %v3868_v6 = vpop.eup %3867 }
 0x899   :  { %v2503_v8 = vadd.f32 1.0, %v3868_v6  ;;  %v3870_v10 = vpop.eup %3869 }
 0x89a   :  { %v2510_v13 = vadd.f32 1.0, %v3870_v10 }
 0x89b   :  { %3871 = vrcp.f32 %v2503_v8 }
 0x89c   :  { %3873 = vrcp.f32 %v2510_v13 }
 0x8a5   :  { %v3872_v20 = vpop.eup %3871 }
 0x8a6   :  { %v2514_v54 = vmul.f32 %v3872_v20, %v2513_v15  ;;  %v3874_v25 = vpop.eup %3873 }
 0x8a7   :  { %v2517_v27 = vsub.f32 1.0, %v3874_v25  ;;  %v2519_v43 = vmul.f32 %v3874_v25, %v4650_v62  ;;  %v3790_v25 = vld [vmem:[#allocation12 + $0x8] sm:$0xff]  }
 0x8a8   :  { %v2515_v21 = vadd.f32 %v2514_v54, %v4382_v38 }
 0x8aa   :  { %3875 = vtanh.f32 %v2515_v21  ;;  %v3789_v21 = vld [vmem:[#allocation12] sm:$0xff]  }
 0x8ab   :  { %3877 = vpow2.f32 %v2719_v46 }
 0x8ac   :  { %3879 = vpow2.f32 %v2734_v51 }
 0x8ad   :  { %3881 = vpow2.f32 %v2704_v22 }
 0x8ae   :  { %3883 = vpow2.f32 %v2749_v31 }
 0x8af   :  { %3885 = vpow2.f32 %v2764_v26 }
 0x8b0   :  { %3887 = vpow2.f32 %v2779_v19 }
 0x8b1   :  { %3889 = vpow2.f32 %v2794_v40 }
 0x8b2   :  { %3891 = vpow2.f32 %v2809_v5 }
 0x8b4   :  { %v3876_v39 = vpop.eup %3875 }
 0x8b5   :  { %v2518_v41 = vmul.f32 %v3876_v39, %v2517_v27  ;;  %v3878_v37 = vpop.eup %3877  ;;  %v3791_v27 = vld [vmem:[#allocation12 + $0x10] sm:$0xff]   ;;  %v3792_v39 = vld [vmem:[#allocation12 + $0x18] sm:$0xff]  }
 0x8b6   :  { %v2721_v24 = vmul.f32 %v3878_v37, %v2699_v7  ;;  %v3880_v36 = vpop.eup %3879 }
 0x8b7   :  { %v4679_v47 = vadd.f32 %v2519_v43, %v2518_v41  ;;  %v3882_v0 = vpop.eup %3881  ;;  %v2736_v23 = vmul.f32 %v3880_v36, %v2699_v7  ;;  %v3793_v41 = vld [vmem:[#allocation12 + $0x20] sm:$0xff]   ;;  %v3794_v43 = vld [vmem:[#allocation12 + $0x28] sm:$0xff]  }
 0x8b8   :  { %v3884_v28 = vpop.eup %3883  ;;  %v2706_v32 = vmul.f32 %v3882_v0, %v2699_v7 }
 0x8b9   :  { %v2523_v48 = vpack.c.bf16 %v4679_v47, %v4679_v47  ;;  %v2751_v4 = vmul.f32 %v3884_v28, %v2699_v7  ;;  %v3886_v6 = vpop.eup %3885 }
 0x8ba   :  { %v2766_v8 = vmul.f32 %v3886_v6, %v2699_v7  ;;  %v3888_v10 = vpop.eup %3887 }
 0x8bb   :  { %3590 = vmatmul.mubr.bf16.vlgmr.msra.gmra.mrb[48].mxu0 %v2523_v48  ;;  %v2781_v13 = vmul.f32 %v3888_v10, %v2699_v7  ;;  %v3890_v50 = vpop.eup %3889  ;;  %v3795_v48 = vld [vmem:[#allocation12 + $0x30] sm:$0xff]  }
 0x8bc   :  { %v2796_v15 = vmul.f32 %v3890_v50, %v2699_v7  ;;  %v3892_v20 = vpop.eup %3891 }
 0x8bd   :  { %v2811_v54 = vmul.f32 %v3892_v20, %v2699_v7 }
 0x98e   :  { %v2622_v49 = vpop.f32.mrb[48].mxu0 }
 0x98f   :  { %v3591_v45 = vpop.f32.mrb[49].mxu0  ;;  %v2838_v38 = vpack.c.bf16 %v2622_v49, %v2622_v49  ;;  %v2637_v42 = vmul.f32 %v2622_v49, %v4473_v56  ;;  %v2629_v52 = vmul.f32 %v2622_v49, %v4402_v14  ;;  %v2641_v58 = vmul.f32 %v2622_v49, %v4542_v12 }
 0x990   :  { %v2625_v44 = vpop.f32.mrb[50].mxu0  ;;  %v2633_v59 = vmul.f32 %v2622_v49, %v4438_v35  ;;  %v2649_v63 = vmul.f32 %v2622_v49, %v4614_v17  ;;  %v2645_v34 = vmul.f32 %v2622_v49, %v4578_v29  ;;  %v2657_v61 = vmul.f32 %v2622_v49, %v4679_v47 }
 0x991   :  { %3610 = vmatmul.mubr.bf16.vlgmr.msra.gmra.mrb[40].mxu1 %v2838_v38  ;;  %2638 = vadd.xlane.f32.xlu1 %v2637_v42  ;;  %v3592_v55 = vpop.f32.mrb[51].mxu0  ;;  %v2653_v1 = vmul.f32 %v2622_v49, %v4650_v62 }
 0x992   :  { %2630 = vadd.xlane.f32.xlu0 %v2629_v52  ;;  %3629 = vmatprep.mubr.msk.bf16.mxu1 %vm4090_vm1, %v4089_v16 }
 0x993   :  { %3614 = vmatpush3.bf16.msra.mxu1 %v3789_v21 }
 0x994   :  { %3615 = vmatprep.subr.bf16.mxu1 %v4089_v16 }
 0x995   :  { %2642 = vadd.xlane.f32.xlu1 %v2641_v58 }
 0x996   :  { %2634 = vadd.xlane.f32.xlu0 %v2633_v59 }
 0x997   :  { %3616 = vmatpush3.bf16.msra.mxu1 %v3790_v25 }
 0x998   :  { %3617 = vmatprep.subr.bf16.mxu1 %v4089_v16 }
 0x999   :  { %2650 = vadd.xlane.f32.xlu1 %v2649_v63 }
 0x99a   :  { %2646 = vadd.xlane.f32.xlu0 %v2645_v34 }
 0x99b   :  { %3618 = vmatpush3.bf16.msra.mxu1 %v3791_v27 }
 0x99c   :  { %3619 = vmatprep.subr.bf16.mxu1 %v4089_v16 }
 0x99d   :  { %2658 = vadd.xlane.f32.xlu1 %v2657_v61 }
 0x99e   :  { %2654 = vadd.xlane.f32.xlu0 %v2653_v1 }
 0x99f   :  { %3620 = vmatpush3.bf16.msra.mxu1 %v3792_v39 }
 0x9a0   :  { %3621 = vmatprep.subr.bf16.mxu1 %v4089_v16 }
 0x9a3   :  { %3622 = vmatpush3.bf16.msra.mxu1 %v3793_v41 }
 0x9a4   :  { %3623 = vmatprep.subr.bf16.mxu1 %v4089_v16 }
 0x9a7   :  { %3624 = vmatpush3.bf16.msra.mxu1 %v3794_v43 }
 0x9a8   :  { %3625 = vmatprep.subr.bf16.mxu1 %v4089_v16 }
 0x9ab   :  { %3626 = vmatpush3.bf16.msra.mxu1 %v3795_v48 }
 0x9ac   :  { %3627 = vmatprep.subr.bf16.mxu1 %v4089_v16 }
 0x9ae   :  { %2725 = vperm.xlu1 %3652, %v2721_v24  }
 0x9af   :  { %3628 = vmatpush3.bf16.msra.mxu1 %v3796_v2 }
 0x9b2   :  { %2740 = vperm.xlu1 %3652, %v2736_v23  }
 0x9b4   :  { %2710 = vperm.xlu0 %3651, %v2706_v32  }
 0x9b6   :  { %2755 = vperm.xlu1 %3652, %v2751_v4  }
 0x9ba   :  { %2770 = vperm.xlu1 %3652, %v2766_v8  }
 0x9be   :  { %2785 = vperm.xlu1 %3652, %v2781_v13  }
 0x9c2   :  { %2800 = vperm.xlu1 %3652, %v2796_v15  }
 0x9c6   :  { %2815 = vperm.xlu1 %3652, %v2811_v54  }
 0xa1e   :  { %v2639_v49 = vpop.xlane.xlu1 %2638 }
 0xa1f   :  { %v2631_v45 = vpop.xlane.xlu0 %2630 }
 0xa22   :  { %v2643_v38 = vpop.xlane.xlu1 %2642 }
 0xa23   :  { %v2635_v42 = vpop.xlane.xlu0 %2634 }
 0xa24   :  { %v2660_v52 = vmax.f32 %v2631_v45, %v2635_v42 }
 0xa26   :  { %v2661_v44 = vmax.f32 %v2660_v52, %v2639_v49  ;;  %v2651_v58 = vpop.xlane.xlu1 %2650 }
 0xa27   :  { %v2647_v55 = vpop.xlane.xlu0 %2646 }
 0xa28   :  { %v2662_v57 = vmax.f32 %v2661_v44, %v2643_v38 }
 0xa2a   :  { %v2663_v59 = vmax.f32 %v2662_v57, %v2647_v55  ;;  %v2659_v46 = vpop.xlane.xlu1 %2658 }
 0xa2b   :  { %v2655_v63 = vpop.xlane.xlu0 %2654 }
 0xa2c   :  { %v2664_v60 = vmax.f32 %v2663_v59, %v2651_v58 }
 0xa2e   :  { %v2665_v34 = vmax.f32 %v2664_v60, %v2655_v63  ;;  %v2726_v20 = vpop.permute.xlu1 %2725 }
 0xa30   :  { %v2666_v9 = vmax.f32 %v2665_v34, %v2659_v46 }
 0xa32   :  { %v2667_v61 = vsub.f32 %v2631_v45, %v2666_v9  ;;  %v2670_v18 = vsub.f32 %v2635_v42, %v2666_v9  ;;  %v2673_v1 = vsub.f32 %v2639_v49, %v2666_v9  ;;  %v2676_v16 = vsub.f32 %v2643_v38, %v2666_v9  ;;  %v2741_v54 = vpop.permute.xlu1 %2740 }
 0xa33   :  { %v2679_v31 = vsub.f32 %v2647_v55, %v2666_v9  ;;  %v2682_v26 = vsub.f32 %v2651_v58, %v2666_v9  ;;  %v2685_v37 = vsub.f32 %v2655_v63, %v2666_v9  ;;  %v2688_v19 = vsub.f32 %v2659_v46, %v2666_v9  ;;  %v2711_v39 = vpop.permute.xlu0 %2710 }
 0xa34   :  { %v2668_v51 = vmul.f32 1.442695, %v2667_v61  ;;  %v2671_v53 = vmul.f32 1.442695, %v2670_v18  ;;  %v2674_v22 = vmul.f32 1.442695, %v2673_v1 }
 0xa35   :  { %v2677_v30 = vmul.f32 1.442695, %v2676_v16  ;;  %v2680_v33 = vmul.f32 1.442695, %v2679_v31  ;;  %v2683_v7 = vmul.f32 1.442695, %v2682_v26 }
 0xa36   :  { %3893 = vpow2.f32 %v2668_v51  ;;  %v2686_v11 = vmul.f32 1.442695, %v2685_v37  ;;  %v2689_v24 = vmul.f32 1.442695, %v2688_v19  ;;  %v2756_v2 = vpop.permute.xlu1 %2755 }
 0xa37   :  { %3895 = vpow2.f32 %v2671_v53 }
 0xa38   :  { %3897 = vpow2.f32 %v2674_v22 }
 0xa39   :  { %3899 = vpow2.f32 %v2677_v30 }
 0xa3a   :  { %3901 = vpow2.f32 %v2680_v33  ;;  %v2771_v55 = vpop.permute.xlu1 %2770 }
 0xa3b   :  { %3903 = vpow2.f32 %v2683_v7 }
 0xa3c   :  { %3905 = vpow2.f32 %v2686_v11 }
 0xa3d   :  { %3907 = vpow2.f32 %v2689_v24 }
 0xa3e   :  { %v2786_v18 = vpop.permute.xlu1 %2785 }
 0xa40   :  { %v3894_v36 = vpop.eup %3893 }
 0xa41   :  { %v3896_v0 = vpop.eup %3895 }
 0xa42   :  { %v2691_v40 = vadd.f32 %v3896_v0, %v3894_v36  ;;  %v3898_v3 = vpop.eup %3897  ;;  %v2801_v30 = vpop.permute.xlu1 %2800 }
 0xa43   :  { %v3900_v28 = vpop.eup %3899 }
 0xa44   :  { %v2692_v23 = vadd.f32 %v3898_v3, %v2691_v40  ;;  %v3902_v5 = vpop.eup %3901 }
 0xa45   :  { %v3904_v6 = vpop.eup %3903 }
 0xa46   :  { %v2693_v32 = vadd.f32 %v3900_v28, %v2692_v23  ;;  %v3906_v10 = vpop.eup %3905 }
 0xa47   :  { %v3908_v50 = vpop.eup %3907 }
 0xa48   :  { %v2694_v4 = vadd.f32 %v3902_v5, %v2693_v32 }
 0xa4a   :  { %v2695_v8 = vadd.f32 %v3904_v6, %v2694_v4 }
 0xa4c   :  { %v2696_v13 = vadd.f32 %v3906_v10, %v2695_v8 }
 0xa4e   :  { %v2697_v15 = vadd.f32 %v3908_v50, %v2696_v13 }
 0xa50   :  { %3909 = vrcp.f32 %v2697_v15 }
 0xa5a   :  { %v3910_v21 = vpop.eup %3909 }
 0xa5b   :  { %v2716_v25 = vmul.f32 %v3910_v21, %v3896_v0  ;;  %v2701_v27 = vmul.f32 %v3910_v21, %v3894_v36  ;;  %v2731_v43 = vmul.f32 %v3910_v21, %v3898_v3  ;;  %v2746_v42 = vmul.f32 %v3910_v21, %v3900_v28  ;;  %v2816_v0 = vpop.permute.xlu1 %2815 }
 0xa5c   :  { %v2761_v57 = vmul.f32 %v3910_v21, %v3902_v5  ;;  %v2806_v26 = vmul.f32 %v3910_v21, %v3908_v50 }
 0xa5d   :  { %v2717_v41 = vmul.f32 %v2716_v25, %v4438_v35  ;;  %v2702_v48 = vmul.f32 %v2701_v27, %v4402_v14  ;;  %v2732_v38 = vmul.f32 %v2731_v43, %v4473_v56  ;;  %v2747_v60 = vmul.f32 %v2746_v42, %v4542_v12 }
 0xa5e   :  { %v2776_v35 = vmul.f32 %v3910_v21, %v3904_v6  ;;  %v2762_v14 = vmul.f32 %v2761_v57, %v4578_v29  ;;  %v2791_v56 = vmul.f32 %v3910_v21, %v3906_v10  ;;  %v2807_v24 = vmul.f32 %v2806_v26, %v4679_v47 }
 0xa5f   :  { %v2713_v49 = vmul.f32 %v2711_v39, %v2702_v48  ;;  %v2728_v45 = vmul.f32 %v2726_v20, %v2717_v41  ;;  %v2743_v59 = vmul.f32 %v2741_v54, %v2732_v38  ;;  %v2758_v9 = vmul.f32 %v2756_v2, %v2747_v60 }
 0xa60   :  { %v2773_v51 = vmul.f32 %v2771_v55, %v2762_v14  ;;  %v2777_v53 = vmul.f32 %v2776_v35, %v4614_v17  ;;  %v2792_v37 = vmul.f32 %v2791_v56, %v4650_v62  ;;  %v2818_v23 = vmul.f32 %v2816_v0, %v2807_v24 }
 0xa61   :  { %v2714_v52 = vmax.f32 %v2713_v49, 0.0  ;;  %v2729_v58 = vmax.f32 %v2728_v45, 0.0  ;;  %v2744_v46 = vmax.f32 %v2743_v59, 0.0  ;;  %v2759_v16 = vmax.f32 %v2758_v9, 0.0 }
 0xa62   :  { %v2774_v12 = vmax.f32 %v2773_v51, 0.0  ;;  %v2788_v33 = vmul.f32 %v2786_v18, %v2777_v53  ;;  %v2803_v29 = vmul.f32 %v2801_v30, %v2792_v37  ;;  %v2819_v32 = vmax.f32 %v2818_v23, 0.0 }
 0xa63   :  { %v2715_v44 = vadd.f32 %v2714_v52, %v2702_v48 }
 0xa64   :  { %v2789_v11 = vmax.f32 %v2788_v33, 0.0  ;;  %v2804_v3 = vmax.f32 %v2803_v29, 0.0 }
 0xa65   :  { %v2722_v63 = vadd.f32 %v2717_v41, %v2715_v44 }
 0xa67   :  { %v2730_v34 = vadd.f32 %v2729_v58, %v2722_v63 }
 0xa69   :  { %v2737_v61 = vadd.f32 %v2732_v38, %v2730_v34 }
 0xa6b   :  { %v2745_v1 = vadd.f32 %v2744_v46, %v2737_v61 }
 0xa6d   :  { %v2752_v22 = vadd.f32 %v2747_v60, %v2745_v1 }
 0xa6f   :  { %v2760_v31 = vadd.f32 %v2759_v16, %v2752_v22 }
 0xa71   :  { %v2767_v7 = vadd.f32 %v2762_v14, %v2760_v31 }
 0xa73   :  { %v2775_v19 = vadd.f32 %v2774_v12, %v2767_v7 }
 0xa75   :  { %v2782_v36 = vadd.f32 %v2777_v53, %v2775_v19 }
 0xa77   :  { %v2790_v40 = vadd.f32 %v2789_v11, %v2782_v36 }
 0xa79   :  { %v2797_v17 = vadd.f32 %v2792_v37, %v2790_v40 }
 0xa7b   :  { %v2805_v28 = vadd.f32 %v2804_v3, %v2797_v17 }
 0xa7d   :  { %v2812_v5 = vadd.f32 %v2807_v24, %v2805_v28 }
 0xa7f   :  { %v2820_v4 = vadd.f32 %v2819_v32, %v2812_v5 }
 0xa81   :  { %v2821_v6 = vpack.c.bf16 %v2820_v4, %v2820_v4 }
 0xa83   :  { %3630 = vmatmul.mubr.bf16.vlgmr.msra.gmra.mrb[40].mxu1 %v2821_v6 }
 0xb56   :  { %v3025_v8 = vpop.f32.mrb[40].mxu1 }
 0xb57   :  { %3911 = vtanh.f32 %v3025_v8  ;;  %v3631_v62 = vpop.f32.mrb[41].mxu1 }
 0xb58   :  { %v3028_v10 = vpop.f32.mrb[42].mxu1 }
 0xb59   :  { %v3632_v13 = vpop.f32.mrb[43].mxu1 }
 0xb61   :  { %v3912_v47 = vpop.eup %3911 }
 0xb62   :  { %3032 = vst [vmem:[#allocation15] sm:$0xff] %v3912_v47 }
 0xb63   :  { %4057 = shalt.err (!%p4054_p10)
}
 0xb64   :  { %s4058_s1 = scalar_lea.hbm %s4737_s10, 128 }
 0xb65   :  { %p4059_p11 = scmp.ne.s32.totalorder %s4737_s10, %s4058_s1  ;;  %p4062_p12 = scmp.lt.u32.totalorder %s4058_s1, %s4737_s10 }
 0xb67   :  { %p4064_p13 = pnand %p4062_p12, %p4059_p11 }
 0xb69   :  { %4067 = shalt.err (!%p4064_p13)
}
 0xb6a   :  { %3042 = dma.vmem_to_hbm [thread:$0]  %s3040_s5, 128, %s4737_s10, [#allocation6]  }
 0xb6b   :  { %4076 = dma.done.wait [#allocation6], 128  }
 0xb6c   :  { %4077 = vsyncadd [#allocation6], 4294967168 }
 0xb6d   :  { %3046 = vsyncpa [#allocation5], 1 }
 0xb6e   :  { %3047 = vsyncpa [#allocation8], 1 }
 0xb6f   :  { %3048 = vsyncpa [#allocation11], 1 }
 0xb70   :  { %3049 = vsyncpa [#allocation14], 1 }
 0xb71   :  { %3050 = vsyncpa [#allocation6], 1 }

</bundles_post_ra>
